<compile_context>
chip_gen: v6e
topology: v6e:2x2x1
jax: 0.10.0
libtpu: 0.0.40
codegen_flags: <defaults>
</compile_context>

<pallas_src>
import math
import functools

import jax
import jax.numpy as jnp
from jax.experimental import pallas as pl
from jax.experimental.pallas import tpu as pltpu


def _round_up(x, m):
    return ((x + m - 1) // m) * m


def _pad2d(a, rows, cols):
    pr, pc = rows - a.shape[0], cols - a.shape[1]
    if pr == 0 and pc == 0:
        return a
    return jnp.pad(a, ((0, pr), (0, pc)))


def _gcn_kernel_x_resident(x_ref, adj_ref, w1_ref, b1_ref, w2_ref, b2_ref,
                           o_ref, hw2_sc, *, tm):
    """2-phase variant (f_pad <= h_pad): x fully resident in VMEM.

    grid = (2 phases, N_pad // tm row tiles); phases execute in order:
      phase 0: hw2[rows_i] = relu((adj[rows_i, :] @ x) @ W1 + b1) @ W2
      phase 1: out[rows_i] = adj[rows_i, :] @ hw2 + b2
    """
    p = pl.program_id(0)          # phase axis (slow)
    i = pl.program_id(1)          # row-tile axis (fast)
    row0 = pl.multiple_of(i * tm, tm)

    @pl.when(p == 0)
    def _():
        ax = jnp.dot(adj_ref[...], x_ref[...],
                     preferred_element_type=jnp.float32)           # (tm, F) f32
        h = jnp.maximum(
            jnp.dot(ax.astype(w1_ref.dtype), w1_ref[...],
                    preferred_element_type=jnp.float32) + b1_ref[...], 0.0)
        hw2 = jnp.dot(h.astype(w2_ref.dtype), w2_ref[...],
                      preferred_element_type=jnp.float32)           # (tm, C) f32
        # Padded rows (adj rows beyond N are zero) give hw2 = relu(b1) @ W2,
        # which is nonzero.  Harmless: adj's padded *columns* are zero, so
        # phase 1 never picks those scratch rows up.  Never read the padded
        # rows of hw2_sc directly.
        hw2_sc[pl.ds(row0, tm), :] = hw2.astype(hw2_sc.dtype)

    @pl.when(p == 1)
    def _():
        out = jnp.dot(adj_ref[...], hw2_sc[...],
                      preferred_element_type=jnp.float32)           # (tm, C) f32
        o_ref[...] = (out + b2_ref[...]).astype(o_ref.dtype)


def _gcn_kernel_support(x_ref, adj_ref, w1_ref, b1_ref, w2_ref, b2_ref,
                        o_ref, support_sc, hw2_sc, *, tm):
    """3-phase variant (f_pad > h_pad): layer-1 support (x @ W1) precomputed.

    grid = (3 phases, N_pad // tm row tiles); phases execute in order:
      phase 0: support[rows_i] = x[rows_i] @ W1
      phase 1: hw2[rows_i]     = relu(adj[rows_i, :] @ support + b1) @ W2
      phase 2: out[rows_i]     = adj[rows_i, :] @ hw2 + b2
    """
    p = pl.program_id(0)
    i = pl.program_id(1)
    row0 = pl.multiple_of(i * tm, tm)

    @pl.when(p == 0)
    def _():
        s = jnp.dot(x_ref[...], w1_ref[...],
                    preferred_element_type=jnp.float32)             # MXU, f32 acc
        support_sc[pl.ds(row0, tm), :] = s.astype(support_sc.dtype)

    @pl.when(p == 1)
    def _():
        agg = jnp.dot(adj_ref[...], support_sc[...],
                      preferred_element_type=jnp.float32)
        h = jnp.maximum(agg + b1_ref[...], 0.0)                     # f32 epilogue
        hw2 = jnp.dot(h.astype(w2_ref.dtype), w2_ref[...],
                      preferred_element_type=jnp.float32)
        # Padded rows hold relu(b1) @ W2 != 0 -- harmless because adj's padded
        # columns are zero (see x_resident variant); never read the padded
        # rows of support_sc / hw2_sc directly.
        hw2_sc[pl.ds(row0, tm), :] = hw2.astype(hw2_sc.dtype)

    @pl.when(p == 2)
    def _():
        out = jnp.dot(adj_ref[...], hw2_sc[...],
                      preferred_element_type=jnp.float32)
        o_ref[...] = (out + b2_ref[...]).astype(o_ref.dtype)


def gcn_forward(x, adj, params, *, training=False, tm=256):
    """GCN.forward: dropout -> relu(gc1(x, adj)) -> dropout -> gc2(h, adj).

    Eval-mode F.dropout is the identity, which is what this kernel implements.
    """
    # TODO(synk): training-mode dropout (pltpu.prng_seed + prng_random_bits
    # mask on x and h) is not wired in; training=True falls back to eval.
    del training

    w1, b1, w2, b2 = params
    n, f_in = x.shape
    nhid = w1.shape[1]
    nclass = w2.shape[1]

    n_pad = _round_up(n, 128)
    if n_pad % tm != 0:
        tm = 128                    # 128 always divides n_pad
    nt = n_pad // tm
    f_pad = _round_up(f_in, 128)
    h_pad = _round_up(nhid, 128)
    c_pad = _round_up(nclass, 128)

    # Layer-1 association: keep x resident and compute (adj @ x) @ W1 when the
    # feature width is no wider than the hidden width (drops a whole grid
    # phase and the N_pad x h_pad support scratch); otherwise x @ W1 first.
    use_xres = f_pad <= h_pad

    bf16 = jnp.bfloat16
    # Zero padding is exact: padded rows/cols contribute nothing to the real
    # output, which is sliced out at the end.
    xp = _pad2d(x, n_pad, f_pad).astype(bf16)
    adjp = _pad2d(adj, n_pad, n_pad).astype(bf16)
    w1p = _pad2d(w1, f_pad, h_pad).astype(bf16)
    b1p = _pad2d(b1.reshape(1, -1), 1, h_pad).astype(jnp.float32)
    w2p = _pad2d(w2, h_pad, c_pad).astype(bf16)
    b2p = _pad2d(b2.reshape(1, -1), 1, c_pad).astype(jnp.float32)

    if use_xres:
        kernel = functools.partial(_gcn_kernel_x_resident, tm=tm)
        n_phase = 2
        # x: fully resident (block index never changes -> single DMA).
        x_spec = pl.BlockSpec((n_pad, f_pad), lambda p, i: (0, 0))
        # adj: streamed over row tiles in both phases (once per layer).
        adj_spec = pl.BlockSpec((tm, n_pad), lambda p, i: (i, 0))
        scratch_shapes = [pltpu.VMEM((n_pad, c_pad), bf16)]          # hw2
        flops = (2 * n_pad * n_pad * f_pad          # adj @ x
                 + 2 * n_pad * f_pad * h_pad        # (.) @ W1
                 + 2 * n_pad * h_pad * c_pad        # h @ W2
                 + 2 * n_pad * n_pad * c_pad)       # adj @ hw2
        x_vmem = 2 * n_pad * f_pad * 2
        scratch_vmem = n_pad * c_pad * 2
    else:
        kernel = functools.partial(_gcn_kernel_support, tm=tm)
        n_phase = 3
        # x: streamed over row tiles during phase 0 only; parked otherwise.
        x_spec = pl.BlockSpec((tm, f_pad),
                              lambda p, i: (jnp.where(p == 0, i, 0), 0))
        # adj: streamed over row tiles during phases 1 and 2 (once per layer).
        adj_spec = pl.BlockSpec((tm, n_pad),
                                lambda p, i: (jnp.where(p == 0, 0, i), 0))
        scratch_shapes = [pltpu.VMEM((n_pad, h_pad), bf16),          # support
                          pltpu.VMEM((n_pad, c_pad), bf16)]          # hw2
        flops = (2 * n_pad * f_pad * h_pad          # x @ W1
                 + 2 * n_pad * n_pad * h_pad        # adj @ support
                 + 2 * n_pad * h_pad * c_pad        # h @ W2
                 + 2 * n_pad * n_pad * c_pad)       # adj @ hw2
        x_vmem = 2 * tm * f_pad * 2
        scratch_vmem = n_pad * (h_pad + c_pad) * 2

    last_phase = n_phase - 1
    # Output blocks only advance (and are written back) during the final
    # phase; earlier phases park the block at (0, 0).  Correctness relies on
    # Pallas writing a block back only when its block index changes: the
    # parked block is first written at (last_phase, i=0), i.e. before any
    # index change can trigger a writeback.
    out_spec = pl.BlockSpec((tm, c_pad),
                            lambda p, i: (jnp.where(p == last_phase, i, 0), 0))

    # Explicit VMEM budget: resident scratch + double-buffered adj / x /
    # weights / biases / out, with 1.5x headroom, floored at 32 MiB.
    vmem_need = (scratch_vmem
                 + x_vmem
                 + 2 * tm * n_pad * 2                       # adj double buffer
                 + 2 * (f_pad * h_pad + h_pad * c_pad) * 2  # W1, W2
                 + 2 * (h_pad + c_pad) * 4                  # b1, b2
                 + 2 * tm * c_pad * 4)                      # out (f32)
    vmem_limit = min(128 << 20, max(32 << 20, vmem_need * 3 // 2 + (1 << 20)))

    # adj is streamed twice (once per layer); output written once (f32).
    bytes_accessed = int(xp.size * 2 + 2 * adjp.size * 2
                         + w1p.size * 2 + w2p.size * 2
                         + b1p.size * 4 + b2p.size * 4
                         + n_pad * c_pad * 4)

    out_padded = pl.pallas_call(
        kernel,
        out_shape=jax.ShapeDtypeStruct((n_pad, c_pad), jnp.float32),
        grid=(n_phase, nt),
        in_specs=[
            x_spec,
            adj_spec,
            pl.BlockSpec((f_pad, h_pad), lambda p, i: (0, 0)),   # W1 (resident)
            pl.BlockSpec((1, h_pad), lambda p, i: (0, 0)),       # b1
            pl.BlockSpec((h_pad, c_pad), lambda p, i: (0, 0)),   # W2 (resident)
            pl.BlockSpec((1, c_pad), lambda p, i: (0, 0)),       # b2
        ],
        out_specs=out_spec,
        scratch_shapes=scratch_shapes,
        compiler_params=pltpu.CompilerParams(
            # Both axes carry cross-iteration dependencies through the VMEM
            # scratch (the final phase reads hw2 written by every row tile),
            # so neither axis may be megacore-sharded.
            dimension_semantics=("arbitrary", "arbitrary"),
            vmem_limit_bytes=int(vmem_limit),
        ),
        cost_estimate=pl.CostEstimate(flops=flops, transcendentals=0,
                                      bytes_accessed=bytes_accessed),
    )(xp, adjp, w1p, b1p, w2p, b2p)

    return out_padded[:n, :nclass]


def init_gcn_params(key, nfeat, nhid, nclass):
    """Mirrors GraphConvolution.reset_parameters: uniform(-stdv, stdv),
    stdv = 1/sqrt(out_features)."""
    k1, k2, k3, k4 = jax.random.split(key, 4)
    stdv1 = 1.0 / math.sqrt(nhid)
    stdv2 = 1.0 / math.sqrt(nclass)
    w1 = jax.random.uniform(k1, (nfeat, nhid), jnp.float32, -stdv1, stdv1)
    b1 = jax.random.uniform(k2, (1, nhid), jnp.float32, -stdv1, stdv1)
    w2 = jax.random.uniform(k3, (nhid, nclass), jnp.float32, -stdv2, stdv2)
    b2 = jax.random.uniform(k4, (1, nclass), jnp.float32, -stdv2, stdv2)
    return w1, b1, w2, b2


if __name__ == "__main__":
    key = jax.random.PRNGKey(0)

    def make_inputs(k, n, nfeat, nhid, nclass):
        kx, kadj, kp = jax.random.split(k, 3)
        x = jax.random.normal(kx, (n, nfeat), jnp.float32)
        # Symmetric, row-normalized adjacency with self-loops.
        a = (jax.random.uniform(kadj, (n, n)) < 0.05).astype(jnp.float32)
        a = jnp.maximum(a, a.T) + jnp.eye(n, dtype=jnp.float32)
        adj = a / jnp.sum(a, axis=1, keepdims=True)
        params = init_gcn_params(kp, nfeat, nhid, nclass)
        return x, adj, params

    def reference(x, adj, params, use_xres):
        # Pure-JAX reference mirroring the kernel's bf16 operand quantization
        # and chosen layer-1 association (f32 accumulation throughout), so the
        # check stays tight despite the documented bf16 precision decision.
        w1, b1, w2, b2 = params
        bf = jnp.bfloat16
        xb, adjb, w1b, w2b = (t.astype(bf) for t in (x, adj, w1, w2))
        if use_xres:
            ax = jnp.dot(adjb, xb, preferred_element_type=jnp.float32)
            pre = jnp.dot(ax.astype(bf), w1b, preferred_element_type=jnp.float32)
        else:
            s = jnp.dot(xb, w1b, preferred_element_type=jnp.float32)
            pre = jnp.dot(adjb, s.astype(bf), preferred_element_type=jnp.float32)
        h = jnp.maximum(pre + b1, 0.0)
        hw2 = jnp.dot(h.astype(bf), w2b, preferred_element_type=jnp.float32)
        return jnp.dot(adjb, hw2.astype(bf), preferred_element_type=jnp.float32) + b2

    # Two deliberately non-128-aligned configs exercising both kernel variants:
    #   cfg 0: f_pad <= h_pad -> 2-phase x-resident kernel (tm=256, nt=1)
    #   cfg 1: f_pad >  h_pad -> 3-phase support kernel    (tm=128, nt=3)
    configs = [
        (200, 48, 64, 7),
        (300, 200, 64, 7),
    ]
    keys = jax.random.split(key, len(configs))
    for cfg_key, (n, nfeat, nhid, nclass) in zip(keys, configs):
        x, adj, params = make_inputs(cfg_key, n, nfeat, nhid, nclass)

        out = gcn_forward(x, adj, params, training=False)
        jax.block_until_ready(out)
        assert out.shape == (n, nclass)

        use_xres = _round_up(nfeat, 128) <= _round_up(nhid, 128)
        ref = reference(x, adj, params, use_xres)
        max_err = float(jnp.max(jnp.abs(out - ref)))
        assert jnp.allclose(out, ref, atol=2e-2, rtol=2e-2), (n, nfeat, max_err)

    print("KERNEL_OK")
</pallas_src>

<mosaic_0001>
module attributes {stable_mosaic.version = 11 : i64} {
  func.func @_gcn_kernel_x_resident(%arg0: i32, %arg1: i32, %arg2: memref<256x128xbf16, #tpu.memory_space<vmem>>, %arg3: memref<256x256xbf16, #tpu.memory_space<vmem>>, %arg4: memref<128x128xbf16, #tpu.memory_space<vmem>>, %arg5: memref<1x128xf32, #tpu.memory_space<vmem>>, %arg6: memref<128x128xbf16, #tpu.memory_space<vmem>>, %arg7: memref<1x128xf32, #tpu.memory_space<vmem>>, %arg8: memref<256x128xf32, #tpu.memory_space<vmem>>, %arg9: memref<256x128xbf16, #tpu.memory_space<vmem>>) attributes {dimension_semantics = [#tpu.dimension_semantics<arbitrary>, #tpu.dimension_semantics<arbitrary>], iteration_bounds = array<i64: 2, 1>, scalar_prefetch = 0 : i64, scratch_operands = 1 : i64, tpu.core_type = #tpu.core_type<tc>, window_params = [{pipeline_mode = #tpu.pipeline_mode<synchronous>, transform_indices = @transform_0, window_bounds = array<i64: 256, 128>}, {transform_indices = @transform_1, window_bounds = array<i64: 256, 256>}, {pipeline_mode = #tpu.pipeline_mode<synchronous>, transform_indices = @transform_2, window_bounds = array<i64: 128, 128>}, {pipeline_mode = #tpu.pipeline_mode<synchronous>, transform_indices = @transform_3, window_bounds = array<i64: 1, 128>}, {pipeline_mode = #tpu.pipeline_mode<synchronous>, transform_indices = @transform_4, window_bounds = array<i64: 128, 128>}, {pipeline_mode = #tpu.pipeline_mode<synchronous>, transform_indices = @transform_5, window_bounds = array<i64: 1, 128>}, {transform_indices = @transform_6, window_bounds = array<i64: 256, 128>}]} {
    %c256_i32 = arith.constant 256 : i32
    %0 = arith.muli %arg1, %c256_i32 : i32
    %1 = tpu.assume_multiple %0, 256 : i32
    %c0_i32 = arith.constant 0 : i32
    %2 = arith.cmpi eq, %arg0, %c0_i32 : i32
    %3 = arith.extui %2 : i1 to i32
    %c0_i32_0 = arith.constant 0 : i32
    %4 = arith.cmpi ne, %3, %c0_i32_0 : i32
    scf.if %4 {
      %c0 = arith.constant 0 : index
      %c0_2 = arith.constant 0 : index
      %8 = vector.load %arg3[%c0, %c0_2] : memref<256x256xbf16, #tpu.memory_space<vmem>>, vector<256x256xbf16>
      %c0_3 = arith.constant 0 : index
      %c0_4 = arith.constant 0 : index
      %9 = vector.load %arg2[%c0_3, %c0_4] : memref<256x128xbf16, #tpu.memory_space<vmem>>, vector<256x128xbf16>
      %cst = arith.constant dense<0.000000e+00> : vector<256x128xf32>
      %10 = tpu.matmul %8, %9, %cst {dimension_numbers = #tpu.dot_dimension_numbers<[1], [0], [0], [1], [0, 0, 1, 1], [], []>} : vector<256x256xbf16>, vector<256x128xbf16>, vector<256x128xf32> -> vector<256x128xf32>
      %11 = arith.truncf %10 : vector<256x128xf32> to vector<256x128xbf16>
      %c0_5 = arith.constant 0 : index
      %c0_6 = arith.constant 0 : index
      %12 = vector.load %arg4[%c0_5, %c0_6] : memref<128x128xbf16, #tpu.memory_space<vmem>>, vector<128x128xbf16>
      %cst_7 = arith.constant dense<0.000000e+00> : vector<256x128xf32>
      %13 = tpu.matmul %11, %12, %cst_7 {dimension_numbers = #tpu.dot_dimension_numbers<[1], [0], [0], [1], [0, 0, 1, 1], [], []>} : vector<256x128xbf16>, vector<128x128xbf16>, vector<256x128xf32> -> vector<256x128xf32>
      %c0_8 = arith.constant 0 : index
      %c0_9 = arith.constant 0 : index
      %14 = vector.load %arg5[%c0_8, %c0_9] : memref<1x128xf32, #tpu.memory_space<vmem>>, vector<1x128xf32>
      %15 = vector.broadcast %14 : vector<1x128xf32> to vector<256x128xf32>
      %16 = arith.addf %13, %15 : vector<256x128xf32>
      %cst_10 = arith.constant 0.000000e+00 : f32
      %17 = vector.broadcast %cst_10 : f32 to vector<256x128xf32>
      %18 = arith.maximumf %16, %17 : vector<256x128xf32>
      %19 = arith.truncf %18 : vector<256x128xf32> to vector<256x128xbf16>
      %c0_11 = arith.constant 0 : index
      %c0_12 = arith.constant 0 : index
      %20 = vector.load %arg6[%c0_11, %c0_12] : memref<128x128xbf16, #tpu.memory_space<vmem>>, vector<128x128xbf16>
      %cst_13 = arith.constant dense<0.000000e+00> : vector<256x128xf32>
      %21 = tpu.matmul %19, %20, %cst_13 {dimension_numbers = #tpu.dot_dimension_numbers<[1], [0], [0], [1], [0, 0, 1, 1], [], []>} : vector<256x128xbf16>, vector<128x128xbf16>, vector<256x128xf32> -> vector<256x128xf32>
      %22 = arith.truncf %21 : vector<256x128xf32> to vector<256x128xbf16>
      %23 = arith.index_cast %1 : i32 to index
      %c0_14 = arith.constant 0 : index
      %24 = vector.load %arg9[%23, %c0_14] : memref<256x128xbf16, #tpu.memory_space<vmem>>, vector<256x128xbf16>
      tpu.vector_store %arg9[%23, %c0_14], %22 {strides = array<i32>} : memref<256x128xbf16, #tpu.memory_space<vmem>>, vector<256x128xbf16>,
    } else {
    }
    %c1_i32 = arith.constant 1 : i32
    %5 = arith.cmpi eq, %arg0, %c1_i32 : i32
    %6 = arith.extui %5 : i1 to i32
    %c0_i32_1 = arith.constant 0 : i32
    %7 = arith.cmpi ne, %6, %c0_i32_1 : i32
    scf.if %7 {
      %c0 = arith.constant 0 : index
      %c0_2 = arith.constant 0 : index
      %8 = vector.load %arg3[%c0, %c0_2] : memref<256x256xbf16, #tpu.memory_space<vmem>>, vector<256x256xbf16>
      %c0_3 = arith.constant 0 : index
      %c0_4 = arith.constant 0 : index
      %9 = vector.load %arg9[%c0_3, %c0_4] : memref<256x128xbf16, #tpu.memory_space<vmem>>, vector<256x128xbf16>
      %cst = arith.constant dense<0.000000e+00> : vector<256x128xf32>
      %10 = tpu.matmul %8, %9, %cst {dimension_numbers = #tpu.dot_dimension_numbers<[1], [0], [0], [1], [0, 0, 1, 1], [], []>} : vector<256x256xbf16>, vector<256x128xbf16>, vector<256x128xf32> -> vector<256x128xf32>
      %c0_5 = arith.constant 0 : index
      %c0_6 = arith.constant 0 : index
      %11 = vector.load %arg7[%c0_5, %c0_6] : memref<1x128xf32, #tpu.memory_space<vmem>>, vector<1x128xf32>
      %12 = vector.broadcast %11 : vector<1x128xf32> to vector<256x128xf32>
      %13 = arith.addf %10, %12 : vector<256x128xf32>
      %c0_7 = arith.constant 0 : index
      %c0_8 = arith.constant 0 : index
      %14 = vector.load %arg8[%c0_7, %c0_8] : memref<256x128xf32, #tpu.memory_space<vmem>>, vector<256x128xf32>
      tpu.vector_store %arg8[%c0_7, %c0_8], %13 {strides = array<i32>} : memref<256x128xf32, #tpu.memory_space<vmem>>, vector<256x128xf32>,
    } else {
    }
    return
  }
  func.func @transform_0(%arg0: i32, %arg1: i32) -> (i32, i32) {
    %c0_i32 = arith.constant 0 : i32
    %c0_i32_0 = arith.constant 0 : i32
    %c0_i32_1 = arith.constant 0 : i32
    return %c0_i32, %c0_i32_0 : i32, i32
  }
  func.func @transform_1(%arg0: i32, %arg1: i32) -> (i32, i32) {
    %c0_i32 = arith.constant 0 : i32
    %c0_i32_0 = arith.constant 0 : i32
    return %arg1, %c0_i32 : i32, i32
  }
  func.func @transform_2(%arg0: i32, %arg1: i32) -> (i32, i32) {
    %c0_i32 = arith.constant 0 : i32
    %c0_i32_0 = arith.constant 0 : i32
    %c0_i32_1 = arith.constant 0 : i32
    return %c0_i32, %c0_i32_0 : i32, i32
  }
  func.func @transform_3(%arg0: i32, %arg1: i32) -> (i32, i32) {
    %c0_i32 = arith.constant 0 : i32
    %c0_i32_0 = arith.constant 0 : i32
    %c0_i32_1 = arith.constant 0 : i32
    return %c0_i32, %c0_i32_0 : i32, i32
  }
  func.func @transform_4(%arg0: i32, %arg1: i32) -> (i32, i32) {
    %c0_i32 = arith.constant 0 : i32
    %c0_i32_0 = arith.constant 0 : i32
    %c0_i32_1 = arith.constant 0 : i32
    return %c0_i32, %c0_i32_0 : i32, i32
  }
  func.func @transform_5(%arg0: i32, %arg1: i32) -> (i32, i32) {
    %c0_i32 = arith.constant 0 : i32
    %c0_i32_0 = arith.constant 0 : i32
    %c0_i32_1 = arith.constant 0 : i32
    return %c0_i32, %c0_i32_0 : i32, i32
  }
  func.func @transform_6(%arg0: i32, %arg1: i32) -> (i32, i32) {
    %c1_i32 = arith.constant 1 : i32
    %0 = arith.cmpi eq, %arg0, %c1_i32 : i32
    %c0_i32 = arith.constant 0 : i32
    %1 = arith.select %0, %arg1, %c0_i32 : i32
    %c0_i32_0 = arith.constant 0 : i32
    %c0_i32_1 = arith.constant 0 : i32
    return %1, %c0_i32_0 : i32, i32
  }
}

</mosaic_0001>

<bundles_post_ra>
// kernel: tpu_custom_call.1
= control target key start
LH: loop header
LB: loop body
LE: loop exit
PB: predicated region body
PF: predicated region fallthrough
CT: control target
= control target key end

     0   :  { %11 = vsyncpa [#allocation4], 0  ;;  %s3453_s0 = inlined_call_operand.hbm [shape: bf16[256,128], index: 0, kind: input, shape index: {}]   ;;  %s3454_s1 = inlined_call_operand.hbm [shape: bf16[256,256], index: 1, kind: input, shape index: {}]   ;;  %s3455_s2 = inlined_call_operand.hbm [shape: bf16[128,128], index: 2, kind: input, shape index: {}]   ;;  %s3456_s3 = inlined_call_operand.vmem [shape: f32[1,128], index: 3, kind: input, shape index: {}]   ;;  %s3457_s4 = inlined_call_operand.hbm [shape: bf16[128,128], index: 4, kind: input, shape index: {}]   ;;  %s3458_s5 = inlined_call_operand.vmem [shape: f32[1,128], index: 5, kind: input, shape index: {}]   ;;  %s3459_s6 = inlined_call_operand.hbm [shape: f32[256,128], index: 6, kind: output, shape index: {}]  }
   0x1   :  { %12 = vsyncpa [#allocation7], 0 }
   0x2   :  { %13 = vsyncpa [#allocation10], 0 }
   0x3   :  { %14 = vsyncpa [#allocation5], 0 }
   0x4   :  { %16 = vsyncpa [#allocation5 + $0x1], 0  ;;  %s3249_s21 = smov 0   ;;  %s3251_s22 = smov 0  }
   0x5   :  { %s3253_s23 = smov 0  }
   0x6 LB: > { %s3203_s24 = smov [#allocation6]   ;;  %s2133_s26 = sadd.s32 4294967295, %s3201_s23   ;;  %s3201_s23 = sphi %s3253_s23, %s22_s23   ;;  %s3197_s22 = sphi %s3251_s22, %s3466_s22   ;;  %s3193_s21 = sphi %s3249_s21, %s3465_s21  }
   0x7   : > { %s229_s25 = sshll.u32 %s3203_s24, 4  ;;  %s2134_s27 = sadd.s32 4294967294, %s3201_s23   ;;  %s230_s25 = int_to_ptr.vmem [resolvable:$true] %s229_s25 }
   0x8   : > { %p2135_p0 = scmp.ge.s32.totalorder %s3201_s23, 1  ;;  %p200_p1 = scmp.lt.s32.totalorder %s3201_s23, 3 }
   0x9   : > { %p3270_p2 = scmp.eq.s32.totalorder %s2133_s26, 0  ;;  %s34_s7 = sadd.s32 1, %s3197_s22 }
   0xa   : > { %p3274_p3 = pnand %p2135_p0, %p200_p1  ;;  %p3287_p6 = scmp.ge.s32.totalorder %s34_s7, 2 }
   0xb   : > { %s3046_s9 = scalar_lea.vmem %s230_s25, 4096  ;;  %p3054_p11 = scmp.lt.s32.totalorder %s230_s25, %s230_s25 }
   0xc   : > { %p2828_p4 = pneg %p3274_p3  ;;  %p3047_p8 = scmp.ne.s32.totalorder %s230_s25, %s3046_s9 }
   0xd   : > { %p3055_p12 = scmp.lt.s32.totalorder %s3046_s9, %s3046_s9 }
   0xe   : > { %p3282_p5 = pnand %p3270_p2, %p2828_p4 }
   0xf   : > { %p3056_p13 = por %p3055_p12, %p3054_p11 }
  0x10   : > { %p3037_p7 = pneg %p3282_p5 }
  0x12   : > { %p3049_p9 = pnand %p3047_p8, %p3037_p7 }
  0x14   : > { %p3050_p10 = pneg %p3049_p9 }
  0x16   : > { %p3057_p0 = pnand %p3056_p13, %p3050_p10 }
  0x18   : > { %3060 = shalt.err (!%p3057_p0)
}
  0x19   : > { %s3204_s10 = smov 128   ;;  %s3205_s11 = smov 8  }
  0x1a   : > { %2834 = dma.hbm_to_vmem [thread:$0]  (!%p3282_p5), %s3454_s1, 4096, %s230_s25, [#allocation7], %s3204_s10, %s3204_s10, %s3205_s11  }
  0x1b   : > { %s3468_s7 = smov (%p3287_p6, %s34_s7), 0  ;;  %s3206_s14 = smov [#allocation3]  }
  0x1c   : > { %s212_s15 = sshll.u32 %s3206_s14, 4  ;;  %s213_s15 = int_to_ptr.vmem [resolvable:$true] %s212_s15 }
  0x1d   : > { %s3072_s16 = scalar_lea.vmem %s213_s15, 2048  ;;  %p3080_p9 = scmp.lt.s32.totalorder %s213_s15, %s213_s15 }
  0x1e   : > { %p3073_p1 = scmp.ne.s32.totalorder %s213_s15, %s3072_s16  ;;  %p3081_p10 = scmp.lt.s32.totalorder %s3072_s16, %s3072_s16 }
  0x20   : > { %p3075_p4 = pnand %p3073_p1, %p3037_p7  ;;  %p3082_p11 = por %p3081_p10, %p3080_p9 }
  0x22   : > { %p3076_p8 = pneg %p3075_p4 }
  0x24   : > { %p3083_p12 = pnand %p3082_p11, %p3076_p8 }
  0x26   : > { %3086 = shalt.err (!%p3083_p12)
}
  0x27   : > { %s3207_s17 = smov 64   ;;  %s3208_s18 = smov 4  }
  0x28   : > { %2831 = dma.hbm_to_vmem [thread:$0]  (!%p3282_p5), %s3453_s0, 2048, %s213_s15, [#allocation4], %s3207_s17, %s3207_s17, %s3208_s18  }
  0x29   : > { %s3209_s24 = smov [#allocation8]   ;;  %s3210_s8 = smov [#allocation9]  }
  0x2a   : > { %s242_s25 = sshll.u32 %s3209_s24, 4  ;;  %s258_s9 = sshll.u32 %s3210_s8, 4  ;;  %s243_s25 = int_to_ptr.vmem [resolvable:$true] %s242_s25  ;;  %s259_s9 = int_to_ptr.vmem [resolvable:$true] %s258_s9 }
  0x2b   : > { %s3098_s10 = scalar_lea.vmem %s243_s25, 1024  ;;  %p3106_p1 = scmp.lt.s32.totalorder %s243_s25, %s243_s25 }
  0x2c   : > { %p3099_p6 = scmp.ne.s32.totalorder %s243_s25, %s3098_s10  ;;  %p3107_p4 = scmp.lt.s32.totalorder %s3098_s10, %s3098_s10 }
  0x2e   : > { %p3101_p13 = pnand %p3099_p6, %p3037_p7  ;;  %p3108_p8 = por %p3107_p4, %p3106_p1 }
  0x30   : > { %p3102_p0 = pneg %p3101_p13 }
  0x32   : > { %p3109_p9 = pnand %p3108_p8, %p3102_p0 }
  0x34   : > { %3112 = shalt.err (!%p3109_p9)
}
  0x35   : > { %2837 = dma.hbm_to_vmem [thread:$0]  (!%p3282_p5), %s3455_s2, 1024, %s243_s25, [#allocation7], %s3207_s17, %s3207_s17, %s3208_s18  }
  0x36   : > { %s3124_s13 = scalar_lea.vmem %s259_s9, 1024  ;;  %p3132_p6 = scmp.lt.s32.totalorder %s259_s9, %s259_s9 }
  0x37   : > { %p3125_p10 = scmp.ne.s32.totalorder %s259_s9, %s3124_s13  ;;  %p3133_p13 = scmp.lt.s32.totalorder %s3124_s13, %s3124_s13 }
  0x39   : > { %p3127_p11 = pnand %p3125_p10, %p3037_p7  ;;  %p3134_p0 = por %p3133_p13, %p3132_p6 }
  0x3b   : > { %p3128_p12 = pneg %p3127_p11 }
  0x3d   : > { %p3135_p1 = pnand %p3134_p0, %p3128_p12 }
  0x3f   : > { %3138 = shalt.err (!%p3135_p1)
}
  0x40   : > { %2840 = dma.hbm_to_vmem [thread:$0]  (!%p3282_p5), %s3457_s4, 1024, %s259_s9, [#allocation10], %s3207_s17, %s3207_s17, %s3208_s18  }
  0x41   : > { %277 = sbr.rel (%p3274_p3) target bundleno = 1160 (0x488), region = 44 }
  0x46   : > { %3176 = dma.done.wait (%p3270_p2), [#allocation4], 2048  }
  0x47   : > { %3178 = vsyncadd (%p3270_p2), [#allocation4], 4294965248 }
  0x48   : > { %3180 = dma.done.wait (%p3270_p2), [#allocation7], 5120  }
  0x49   : > { %3182 = vsyncadd (%p3270_p2), [#allocation7], 4294962176 }
  0x4a   : > { %3184 = dma.done.wait (%p3270_p2), [#allocation10], 1024  }
  0x4b   : > { %3186 = vsyncadd (%p3270_p2), [#allocation10], 4294966272  ;;  %p2145_p3 = scmp.ne.s32.totalorder %s3193_s21, 0 }
  0x4d   : > { %323 = sbr.rel (%p2145_p3) target bundleno = 846 (0x34e), region = 64 }
  0x52   : > { %v2891_v0 = vld [vmem:[#allocation3 + $0x78] sm:$0xff]   ;;  %v2893_v2 = vld [vmem:[#allocation3 + $0x70] sm:$0xff]   ;;  %v2895_v4 = vld [vmem:[#allocation3 + $0x68] sm:$0xff]  }
  0x53   : > { %v2892_v1 = vld [vmem:[#allocation3 + $0x38] sm:$0xff]   ;;  %2424 = vmatprep.subr.bf16.mxu0 %v2891_v0  ;;  %v2894_v3 = vld [vmem:[#allocation3 + $0x30] sm:$0xff]   ;;  %v2896_v5 = vld [vmem:[#allocation3 + $0x28] sm:$0xff]  }
  0x54   : > { %2425 = vmatpush3.bf16.msra.mxu0 %v2892_v1  ;;  %v2897_v6 = vld [vmem:[#allocation3 + $0x60] sm:$0xff]   ;;  %v2899_v8 = vld [vmem:[#allocation3 + $0x58] sm:$0xff]   ;;  %v2901_v10 = vld [vmem:[#allocation3 + $0x50] sm:$0xff]  }
  0x55   : > { %2426 = vmatprep.subr.bf16.mxu0 %v2893_v2  ;;  %v2898_v7 = vld [vmem:[#allocation3 + $0x20] sm:$0xff]   ;;  %v2900_v9 = vld [vmem:[#allocation3 + $0x18] sm:$0xff]   ;;  %v2902_v12 = vld [vmem:[#allocation3 + $0x10] sm:$0xff]  }
  0x56   : > { %v2909_v11 = vld [vmem:[#allocation6 + $0x4] ss:$8 sps:$4 sm:$0xff]   ;;  %v2907_v17 = vld [vmem:[#allocation6] ss:$8 sps:$4 sm:$0xff]   ;;  %v2910_v18 = vld [vmem:[#allocation6 + $0x14] ss:$8 sps:$4 sm:$0xff]  }
  0x57   : > { %676 = vmatprep.mubr.bf16.mxu0 %v2909_v11  ;;  %v2903_v13 = vld [vmem:[#allocation3 + $0x48] sm:$0xff]   ;;  %v2905_v15 = vld [vmem:[#allocation3 + $0x40] sm:$0xff]   ;;  %v2912_v19 = vld [vmem:[#allocation6 + $0x10] ss:$8 sps:$4 sm:$0xff]  }
  0x58   : > { %2427 = vmatpush3.bf16.msra.mxu0 %v2894_v3  ;;  %v2904_v14 = vld [vmem:[#allocation3 + $0x8] sm:$0xff]   ;;  %v2906_v16 = vld [vmem:[#allocation3] sm:$0xff]   ;;  %v2955_v21 = vld [vmem:[#allocation8 + $0x38] sm:$0xff]  }
  0x59   : > { %2428 = vmatprep.subr.bf16.mxu0 %v2895_v4  ;;  %v2913_v20 = vld [vmem:[#allocation6 + $0x24] ss:$8 sps:$4 sm:$0xff]   ;;  %v2956_v22 = vld [vmem:[#allocation8 + $0x30] sm:$0xff]   ;;  %2696 = vmatprep.subr.bf16.mxu1 %v2955_v21  ;;  %v2915_v24 = vld [vmem:[#allocation6 + $0x20] ss:$8 sps:$4 sm:$0xff]  }
  0x5a   : > { %2697 = vmatpush3.bf16.msra.mxu1 %v2955_v21  ;;  %v2957_v23 = vld [vmem:[#allocation8 + $0x28] sm:$0xff]   ;;  %v2958_v25 = vld [vmem:[#allocation8 + $0x20] sm:$0xff]   ;;  %v2916_v26 = vld [vmem:[#allocation6 + $0x34] ss:$8 sps:$4 sm:$0xff]  }
  0x5b   : > { %2698 = vmatprep.subr.bf16.mxu1 %v2956_v22  ;;  %v2918_v27 = vld [vmem:[#allocation6 + $0x30] ss:$8 sps:$4 sm:$0xff]   ;;  %v2919_v28 = vld [vmem:[#allocation6 + $0x44] ss:$8 sps:$4 sm:$0xff]   ;;  %v2921_v29 = vld [vmem:[#allocation6 + $0x40] ss:$8 sps:$4 sm:$0xff]  }
  0x5c   : > { %2429 = vmatpush3.bf16.msra.mxu0 %v2896_v5  ;;  %v2922_v30 = vld [vmem:[#allocation6 + $0x54] ss:$8 sps:$4 sm:$0xff]   ;;  %v2924_v31 = vld [vmem:[#allocation6 + $0x50] ss:$8 sps:$4 sm:$0xff]   ;;  %v2925_v32 = vld [vmem:[#allocation6 + $0x64] ss:$8 sps:$4 sm:$0xff]  }
  0x5d   : > { %2430 = vmatprep.subr.bf16.mxu0 %v2897_v6  ;;  %v2927_v33 = vld [vmem:[#allocation6 + $0x60] ss:$8 sps:$4 sm:$0xff]   ;;  %v2928_v34 = vld [vmem:[#allocation6 + $0x74] ss:$8 sps:$4 sm:$0xff]   ;;  %v2930_v35 = vld [vmem:[#allocation6 + $0x70] ss:$8 sps:$4 sm:$0xff]  }
  0x5e   : > { %2699 = vmatpush3.bf16.msra.mxu1 %v2956_v22  ;;  %v2931_v36 = vld [vmem:[#allocation6 + $0x84] ss:$8 sps:$4 sm:$0xff]   ;;  %v2933_v37 = vld [vmem:[#allocation6 + $0x80] ss:$8 sps:$4 sm:$0xff]   ;;  %v2934_v38 = vld [vmem:[#allocation6 + $0x94] ss:$8 sps:$4 sm:$0xff]  }
  0x5f   : > { %2700 = vmatprep.subr.bf16.mxu1 %v2957_v23  ;;  %v2959_v39 = vld [vmem:[#allocation8 + $0x18] sm:$0xff]   ;;  %v2937_v41 = vld [vmem:[#allocation6 + $0xa4] ss:$8 sps:$4 sm:$0xff]   ;;  %v2960_v42 = vld [vmem:[#allocation8 + $0x10] sm:$0xff]  }
  0x60   : > { %2431 = vmatpush3.bf16.msra.mxu0 %v2898_v7  ;;  %v2936_v40 = vld [vmem:[#allocation6 + $0x90] ss:$8 sps:$4 sm:$0xff]   ;;  %v2961_v43 = vld [vmem:[#allocation8 + $0x8] sm:$0xff]   ;;  %v2940_v45 = vld [vmem:[#allocation6 + $0xb4] ss:$8 sps:$4 sm:$0xff]  }
  0x61   : > { %2432 = vmatprep.subr.bf16.mxu0 %v2899_v8  ;;  %v2939_v44 = vld [vmem:[#allocation6 + $0xa0] ss:$8 sps:$4 sm:$0xff]   ;;  %v2942_v47 = vld [vmem:[#allocation6 + $0xb0] ss:$8 sps:$4 sm:$0xff]   ;;  %v2943_v48 = vld [vmem:[#allocation6 + $0xc4] ss:$8 sps:$4 sm:$0xff]  }
  0x62   : > { %2701 = vmatpush3.bf16.msra.mxu1 %v2957_v23  ;;  %v2962_v46 = vld [vmem:[#allocation8] sm:$0xff]   ;;  %v2946_v50 = vld [vmem:[#allocation6 + $0xd4] ss:$8 sps:$4 sm:$0xff]   ;;  %v2948_v51 = vld [vmem:[#allocation6 + $0xd0] ss:$8 sps:$4 sm:$0xff]  }
  0x63   : > { %2702 = vmatprep.subr.bf16.mxu1 %v2958_v25  ;;  %v2945_v49 = vld [vmem:[#allocation6 + $0xc0] ss:$8 sps:$4 sm:$0xff]   ;;  %v2949_v52 = vld [vmem:[#allocation6 + $0xe4] ss:$8 sps:$4 sm:$0xff]   ;;  %v2952_v54 = vld [vmem:[#allocation6 + $0xf4] ss:$8 sps:$4 sm:$0xff]  }
  0x64   : > { %2433 = vmatpush3.bf16.msra.mxu0 %v2900_v9  ;;  %v2951_v53 = vld [vmem:[#allocation6 + $0xe0] ss:$8 sps:$4 sm:$0xff]   ;;  %v2954_v55 = vld [vmem:[#allocation6 + $0xf0] ss:$8 sps:$4 sm:$0xff]  }
  0x65   : > { %2434 = vmatprep.subr.bf16.mxu0 %v2901_v10  ;;  %v2963_v58 = vld [vmem:[#allocation9 + $0x38] sm:$0xff]   ;;  %v2964_v8 = vld [vmem:[#allocation9 + $0x30] sm:$0xff]   ;;  %v2965_v11 = vld [vmem:[#allocation9 + $0x28] sm:$0xff]  }
  0x66   : > { %2703 = vmatpush3.bf16.msra.mxu1 %v2958_v25 }
  0x67   : > { %2704 = vmatprep.subr.bf16.mxu1 %v2959_v39 }
  0x68   : > { %2435 = vmatpush3.bf16.msra.mxu0 %v2902_v12 }
  0x69   : > { %2436 = vmatprep.subr.bf16.mxu0 %v2903_v13 }
  0x6a   : > { %2705 = vmatpush3.bf16.msra.mxu1 %v2959_v39 }
  0x6b   : > { %2706 = vmatprep.subr.bf16.mxu1 %v2960_v42 }
  0x6c   : > { %2437 = vmatpush3.bf16.msra.mxu0 %v2904_v14 }
  0x6d   : > { %2438 = vmatprep.subr.bf16.mxu0 %v2905_v15 }
  0x6e   : > { %2707 = vmatpush3.bf16.msra.mxu1 %v2960_v42 }
  0x6f   : > { %2708 = vmatprep.subr.bf16.mxu1 %v2961_v43 }
  0x70   : > { %2439 = vmatpush3.bf16.msra.mxu0 %v2906_v16 }
  0x72   : > { %2709 = vmatpush3.bf16.msra.mxu1 %v2961_v43 }
  0x73   : > { %677 = vmatmul.mubr.bf16.vlgmr.msra.gmra.mxu0 %v2907_v17  ;;  %2710 = vmatprep.subr.bf16.mxu1 %v2962_v46  ;;  %v2966_v17 = vld [vmem:[#allocation9 + $0x20] sm:$0xff]  }
  0x74   : > { %684 = vmatprep.mubr.bf16.mxu0 %v2910_v18 }
  0x76   : > { %2711 = vmatpush3.bf16.msra.mxu1 %v2962_v46 }
  0x77   : > { %2744 = vmatprep.subr.bf16.mxu1 %v2963_v58 }
  0x7b   : > { %685 = vmatmul.mubr.bf16.gmra.mxu0 %v2912_v19 }
  0x7c   : > { %692 = vmatprep.mubr.bf16.mxu0 %v2913_v20  ;;  %v2967_v20 = vld [vmem:[#allocation9 + $0x18] sm:$0xff]  }
  0x83   : > { %693 = vmatmul.mubr.bf16.gmra.mxu0 %v2915_v24 }
  0x84   : > { %700 = vmatprep.mubr.bf16.mxu0 %v2916_v26 }
  0x8b   : > { %701 = vmatmul.mubr.bf16.gmra.mxu0 %v2918_v27 }
  0x8c   : > { %708 = vmatprep.mubr.bf16.mxu0 %v2919_v28 }
  0x93   : > { %709 = vmatmul.mubr.bf16.gmra.mxu0 %v2921_v29 }
  0x94   : > { %716 = vmatprep.mubr.bf16.mxu0 %v2922_v30 }
  0x9b   : > { %717 = vmatmul.mubr.bf16.gmra.mxu0 %v2924_v31 }
  0x9c   : > { %724 = vmatprep.mubr.bf16.mxu0 %v2925_v32 }
  0xa3   : > { %725 = vmatmul.mubr.bf16.gmra.mxu0 %v2927_v33 }
  0xa4   : > { %732 = vmatprep.mubr.bf16.mxu0 %v2928_v34 }
  0xab   : > { %733 = vmatmul.mubr.bf16.gmra.mxu0 %v2930_v35 }
  0xac   : > { %740 = vmatprep.mubr.bf16.mxu0 %v2931_v36 }
  0xb3   : > { %741 = vmatmul.mubr.bf16.gmra.mxu0 %v2933_v37 }
  0xb4   : > { %748 = vmatprep.mubr.bf16.mxu0 %v2934_v38 }
  0xbb   : > { %749 = vmatmul.mubr.bf16.gmra.mxu0 %v2936_v40 }
  0xbc   : > { %756 = vmatprep.mubr.bf16.mxu0 %v2937_v41 }
  0xc3   : > { %757 = vmatmul.mubr.bf16.gmra.mxu0 %v2939_v44 }
  0xc4   : > { %764 = vmatprep.mubr.bf16.mxu0 %v2940_v45 }
  0xcb   : > { %765 = vmatmul.mubr.bf16.gmra.mxu0 %v2942_v47 }
  0xcc   : > { %772 = vmatprep.mubr.bf16.mxu0 %v2943_v48 }
  0xd3   : > { %773 = vmatmul.mubr.bf16.gmra.mxu0 %v2945_v49 }
  0xd4   : > { %780 = vmatprep.mubr.bf16.mxu0 %v2946_v50 }
  0xdb   : > { %781 = vmatmul.mubr.bf16.gmra.mxu0 %v2948_v51 }
  0xdc   : > { %788 = vmatprep.mubr.bf16.mxu0 %v2949_v52 }
  0xe3   : > { %789 = vmatmul.mubr.bf16.gmra.mxu0 %v2951_v53 }
  0xe4   : > { %796 = vmatprep.mubr.bf16.mxu0 %v2952_v54 }
  0xeb   : > { %797 = vmatmul.mubr.bf16.gmra.mxu0 %v2954_v55 }
 0x133   : > { %v2440_v56 = vpop.f32.mrf.mxu0 }
 0x135   : > { %v2441_v57 = vpop.f32.mrf.mxu0 }
 0x136   : > { %v2442_v61 = vadd.f32 %v2441_v57, %v2440_v56 }
 0x137   : > { %v2443_v59 = vpop.f32.mrf.mxu0 }
 0x139   : > { %v2444_v60 = vpop.f32.mrf.mxu0 }
 0x13a   : > { %v2445_v62 = vadd.f32 %v2444_v60, %v2443_v59 }
 0x13b   : > { %v2446_v63 = vpop.f32.mrf.mxu0 }
 0x13c   : > { %v805_v0 = vpack.c.bf16 %v2445_v62, %v2442_v61 }
 0x13d   : > { %v2447_v1 = vpop.f32.mrf.mxu0 }
 0x13e   : > { %2712 = vmatprep.mubr.bf16.mxu1 %v805_v0  ;;  %v2448_v4 = vadd.f32 %v2447_v1, %v2446_v63 }
 0x13f   : > { %v2449_v2 = vpop.f32.mrf.mxu0 }
 0x141   : > { %v2450_v3 = vpop.f32.mrf.mxu0 }
 0x142   : > { %v2451_v5 = vadd.f32 %v2450_v3, %v2449_v2 }
 0x143   : > { %v2452_v6 = vpop.f32.mrf.mxu0 }
 0x144   : > { %v806_v7 = vpack.c.bf16 %v2451_v5, %v2448_v4  ;;  %v2968_v5 = vld [vmem:[#allocation9 + $0x10] sm:$0xff]  }
 0x145   : > { %v2453_v9 = vpop.f32.mrf.mxu0 }
 0x146   : > { %2713 = vmatmul.mubr.bf16.vlgmr.msra.gmra.mxu1 %v806_v7  ;;  %v2454_v13 = vadd.f32 %v2453_v9, %v2452_v6 }
 0x147   : > { %v2455_v10 = vpop.f32.mrf.mxu0  ;;  %2745 = vmatpush3.bf16.msra.mxu1 %v2963_v58 }
 0x148   : > { %2746 = vmatprep.subr.bf16.mxu1 %v2964_v8 }
 0x149   : > { %v2456_v12 = vpop.f32.mrf.mxu0 }
 0x14a   : > { %v2457_v14 = vadd.f32 %v2456_v12, %v2455_v10  ;;  %v2969_v10 = vld [vmem:[#allocation9 + $0x8] sm:$0xff]  }
 0x14b   : > { %v2458_v15 = vpop.f32.mrf.mxu0  ;;  %2747 = vmatpush3.bf16.msra.mxu1 %v2964_v8 }
 0x14c   : > { %v807_v16 = vpack.c.bf16 %v2457_v14, %v2454_v13  ;;  %2748 = vmatprep.subr.bf16.mxu1 %v2965_v11  ;;  %v2970_v14 = vld [vmem:[#allocation9] sm:$0xff]  }
 0x14d   : > { %v2459_v18 = vpop.f32.mrf.mxu0 }
 0x14e   : > { %2716 = vmatprep.mubr.bf16.mxu1 %v807_v16  ;;  %v2460_v22 = vadd.f32 %v2459_v18, %v2458_v15 }
 0x14f   : > { %v2461_v19 = vpop.f32.mrf.mxu0  ;;  %2749 = vmatpush3.bf16.msra.mxu1 %v2965_v11 }
 0x150   : > { %2750 = vmatprep.subr.bf16.mxu1 %v2966_v17 }
 0x151   : > { %v2462_v21 = vpop.f32.mrf.mxu0 }
 0x152   : > { %v2463_v23 = vadd.f32 %v2462_v21, %v2461_v19 }
 0x153   : > { %v2464_v24 = vpop.f32.mrf.mxu0  ;;  %2751 = vmatpush3.bf16.msra.mxu1 %v2966_v17 }
 0x154   : > { %v808_v25 = vpack.c.bf16 %v2463_v23, %v2460_v22  ;;  %2752 = vmatprep.subr.bf16.mxu1 %v2967_v20 }
 0x155   : > { %v2465_v26 = vpop.f32.mrf.mxu0 }
 0x156   : > { %2717 = vmatmul.mubr.bf16.gmra.mxu1 %v808_v25  ;;  %v2466_v29 = vadd.f32 %v2465_v26, %v2464_v24 }
 0x157   : > { %v2467_v27 = vpop.f32.mrf.mxu0  ;;  %2753 = vmatpush3.bf16.msra.mxu1 %v2967_v20 }
 0x158   : > { %2754 = vmatprep.subr.bf16.mxu1 %v2968_v5 }
 0x159   : > { %v2468_v28 = vpop.f32.mrf.mxu0 }
 0x15a   : > { %v2469_v30 = vadd.f32 %v2468_v28, %v2467_v27 }
 0x15b   : > { %v2470_v31 = vpop.f32.mrf.mxu0  ;;  %2755 = vmatpush3.bf16.msra.mxu1 %v2968_v5 }
 0x15c   : > { %v809_v32 = vpack.c.bf16 %v2469_v30, %v2466_v29  ;;  %2756 = vmatprep.subr.bf16.mxu1 %v2969_v10 }
 0x15d   : > { %v2471_v33 = vpop.f32.mrf.mxu0 }
 0x15e   : > { %2720 = vmatprep.mubr.bf16.mxu1 %v809_v32  ;;  %v2472_v36 = vadd.f32 %v2471_v33, %v2470_v31 }
 0x15f   : > { %v2473_v34 = vpop.f32.mrf.mxu0  ;;  %2757 = vmatpush3.bf16.msra.mxu1 %v2969_v10 }
 0x160   : > { %2758 = vmatprep.subr.bf16.mxu1 %v2970_v14 }
 0x161   : > { %v2474_v35 = vpop.f32.mrf.mxu0 }
 0x162   : > { %v2475_v37 = vadd.f32 %v2474_v35, %v2473_v34 }
 0x163   : > { %v2476_v38 = vpop.f32.mrf.mxu0  ;;  %2759 = vmatpush3.bf16.msra.mxu1 %v2970_v14 }
 0x164   : > { %v810_v39 = vpack.c.bf16 %v2475_v37, %v2472_v36 }
 0x165   : > { %v2477_v40 = vpop.f32.mrf.mxu0 }
 0x166   : > { %2721 = vmatmul.mubr.bf16.gmra.mxu1 %v810_v39  ;;  %v2478_v43 = vadd.f32 %v2477_v40, %v2476_v38 }
 0x167   : > { %v2479_v41 = vpop.f32.mrf.mxu0 }
 0x169   : > { %v2480_v42 = vpop.f32.mrf.mxu0 }
 0x16a   : > { %v2481_v44 = vadd.f32 %v2480_v42, %v2479_v41 }
 0x16b   : > { %v2482_v45 = vpop.f32.mrf.mxu0 }
 0x16c   : > { %v811_v46 = vpack.c.bf16 %v2481_v44, %v2478_v43 }
 0x16d   : > { %v2483_v47 = vpop.f32.mrf.mxu0 }
 0x16e   : > { %2724 = vmatprep.mubr.bf16.mxu1 %v811_v46  ;;  %v2484_v50 = vadd.f32 %v2483_v47, %v2482_v45 }
 0x16f   : > { %v2485_v48 = vpop.f32.mrf.mxu0 }
 0x171   : > { %v2486_v49 = vpop.f32.mrf.mxu0 }
 0x172   : > { %v2487_v51 = vadd.f32 %v2486_v49, %v2485_v48 }
 0x173   : > { %v2488_v52 = vpop.f32.mrf.mxu0 }
 0x174   : > { %v812_v53 = vpack.c.bf16 %v2487_v51, %v2484_v50  ;;  %v3356_v50 = vld [vmem:[%s3456_s3] ss:$0 sm:$0xff] }
 0x175   : > { %v2489_v54 = vpop.f32.mrf.mxu0 }
 0x176   : > { %2725 = vmatmul.mubr.bf16.gmra.mxu1 %v812_v53  ;;  %v2490_v57 = vadd.f32 %v2489_v54, %v2488_v52 }
 0x177   : > { %v2491_v55 = vpop.f32.mrf.mxu0 }
 0x179   : > { %v2492_v56 = vpop.f32.mrf.mxu0 }
 0x17a   : > { %v2493_v58 = vadd.f32 %v2492_v56, %v2491_v55 }
 0x17b   : > { %v2494_v59 = vpop.f32.mrf.mxu0 }
 0x17c   : > { %v813_v60 = vpack.c.bf16 %v2493_v58, %v2490_v57 }
 0x17d   : > { %v2495_v61 = vpop.f32.mrf.mxu0 }
 0x17e   : > { %2728 = vmatprep.mubr.bf16.mxu1 %v813_v60  ;;  %v2496_v0 = vadd.f32 %v2495_v61, %v2494_v59 }
 0x17f   : > { %v2497_v62 = vpop.f32.mrf.mxu0 }
 0x181   : > { %v2498_v63 = vpop.f32.mrf.mxu0 }
 0x182   : > { %v2499_v1 = vadd.f32 %v2498_v63, %v2497_v62 }
 0x183   : > { %v2500_v2 = vpop.f32.mrf.mxu0 }
 0x184   : > { %v814_v3 = vpack.c.bf16 %v2499_v1, %v2496_v0 }
 0x185   : > { %v2501_v4 = vpop.f32.mrf.mxu0 }
 0x186   : > { %2729 = vmatmul.mubr.bf16.gmra.mxu1 %v814_v3  ;;  %v2502_v8 = vadd.f32 %v2501_v4, %v2500_v2 }
 0x187   : > { %v2503_v6 = vpop.f32.mrf.mxu0 }
 0x189   : > { %v2504_v7 = vpop.f32.mrf.mxu0 }
 0x18a   : > { %v2505_v9 = vadd.f32 %v2504_v7, %v2503_v6 }
 0x18b   : > { %v2506_v11 = vpop.f32.mrf.mxu0 }
 0x18c   : > { %v815_v12 = vpack.c.bf16 %v2505_v9, %v2502_v8 }
 0x18d   : > { %v2507_v13 = vpop.f32.mrf.mxu0 }
 0x18e   : > { %2732 = vmatprep.mubr.bf16.mxu1 %v815_v12  ;;  %v2508_v17 = vadd.f32 %v2507_v13, %v2506_v11 }
 0x18f   : > { %v2509_v15 = vpop.f32.mrf.mxu0 }
 0x191   : > { %v2510_v16 = vpop.f32.mrf.mxu0 }
 0x192   : > { %v2511_v18 = vadd.f32 %v2510_v16, %v2509_v15 }
 0x193   : > { %v2512_v19 = vpop.f32.mrf.mxu0 }
 0x194   : > { %v816_v20 = vpack.c.bf16 %v2511_v18, %v2508_v17 }
 0x195   : > { %v2513_v21 = vpop.f32.mrf.mxu0 }
 0x196   : > { %2733 = vmatmul.mubr.bf16.gmra.mxu1 %v816_v20  ;;  %v2514_v24 = vadd.f32 %v2513_v21, %v2512_v19 }
 0x197   : > { %v2515_v22 = vpop.f32.mrf.mxu0 }
 0x199   : > { %v2516_v23 = vpop.f32.mrf.mxu0 }
 0x19a   : > { %v2517_v25 = vadd.f32 %v2516_v23, %v2515_v22 }
 0x19b   : > { %v2518_v26 = vpop.f32.mrf.mxu0 }
 0x19c   : > { %v817_v27 = vpack.c.bf16 %v2517_v25, %v2514_v24 }
 0x19d   : > { %v2519_v28 = vpop.f32.mrf.mxu0 }
 0x19e   : > { %2736 = vmatprep.mubr.bf16.mxu1 %v817_v27  ;;  %v2520_v31 = vadd.f32 %v2519_v28, %v2518_v26 }
 0x19f   : > { %v2521_v29 = vpop.f32.mrf.mxu0 }
 0x1a1   : > { %v2522_v30 = vpop.f32.mrf.mxu0 }
 0x1a2   : > { %v2523_v32 = vadd.f32 %v2522_v30, %v2521_v29 }
 0x1a3   : > { %v2524_v33 = vpop.f32.mrf.mxu0 }
 0x1a4   : > { %v818_v34 = vpack.c.bf16 %v2523_v32, %v2520_v31 }
 0x1a5   : > { %v2525_v35 = vpop.f32.mrf.mxu0 }
 0x1a6   : > { %2737 = vmatmul.mubr.bf16.gmra.mxu1 %v818_v34  ;;  %v2526_v38 = vadd.f32 %v2525_v35, %v2524_v33 }
 0x1a7   : > { %v2527_v36 = vpop.f32.mrf.mxu0 }
 0x1a9   : > { %v2528_v37 = vpop.f32.mrf.mxu0 }
 0x1aa   : > { %v2529_v39 = vadd.f32 %v2528_v37, %v2527_v36 }
 0x1ab   : > { %v2530_v40 = vpop.f32.mrf.mxu0 }
 0x1ac   : > { %v819_v41 = vpack.c.bf16 %v2529_v39, %v2526_v38 }
 0x1ad   : > { %v2531_v42 = vpop.f32.mrf.mxu0 }
 0x1ae   : > { %2740 = vmatprep.mubr.bf16.mxu1 %v819_v41  ;;  %v2532_v45 = vadd.f32 %v2531_v42, %v2530_v40 }
 0x1af   : > { %v2533_v43 = vpop.f32.mrf.mxu0 }
 0x1b1   : > { %v2534_v44 = vpop.f32.mrf.mxu0 }
 0x1b2   : > { %v2535_v46 = vadd.f32 %v2534_v44, %v2533_v43 }
 0x1b4   : > { %v820_v47 = vpack.c.bf16 %v2535_v46, %v2532_v45 }
 0x1b6   : > { %2741 = vmatmul.mubr.bf16.gmra.mxu1 %v820_v47 }
 0x206   : > { %v2714_v48 = vpop.f32.mrf.mxu1 }
 0x207   : > { %v935_v54 = vadd.f32 %v2714_v48, %v3356_v50 }
 0x208   : > { %v926_v49 = vpop.f32.mrf.mxu1 }
 0x209   : > { %v927_v52 = vadd.f32 %v3356_v50, %v926_v49  ;;  %v1055_v60 = vmax.f32 %v935_v54, 0.0 }
 0x20a   : > { %v2715_v51 = vpop.f32.mrf.mxu1 }
 0x20b   : > { %v938_v53 = vadd.f32 %v2715_v51, %v3356_v50  ;;  %v1053_v58 = vmax.f32 %v927_v52, 0.0 }
 0x20c   : > { %v929_v55 = vpop.f32.mrf.mxu1 }
 0x20d   : > { %v930_v56 = vadd.f32 %v3356_v50, %v929_v55  ;;  %v1056_v57 = vmax.f32 %v938_v53, 0.0 }
 0x20f   : > { %v1054_v59 = vmax.f32 %v930_v56, 0.0  ;;  %v1086_v62 = vpack.c.bf16 %v1056_v57, %v1055_v60 }
 0x211   : > { %v1085_v61 = vpack.c.bf16 %v1054_v59, %v1053_v58 }
 0x213   : > { %2760 = vmatprep.mubr.bf16.mxu1 %v1085_v61 }
 0x214   : > { %2761 = vmatmul.mubr.bf16.vlgmr.msra.gmra.mxu1 %v1086_v62 }
 0x216   : > { %v2718_v63 = vpop.f32.mrf.mxu1 }
 0x217   : > { %v951_v4 = vadd.f32 %v2718_v63, %v3356_v50 }
 0x218   : > { %v942_v0 = vpop.f32.mrf.mxu1 }
 0x219   : > { %v943_v2 = vadd.f32 %v3356_v50, %v942_v0  ;;  %v1059_v10 = vmax.f32 %v951_v4, 0.0 }
 0x21a   : > { %v2719_v1 = vpop.f32.mrf.mxu1 }
 0x21b   : > { %v954_v3 = vadd.f32 %v2719_v1, %v3356_v50  ;;  %v1057_v8 = vmax.f32 %v943_v2, 0.0 }
 0x21c   : > { %v945_v5 = vpop.f32.mrf.mxu1 }
 0x21d   : > { %v946_v6 = vadd.f32 %v3356_v50, %v945_v5  ;;  %v1060_v7 = vmax.f32 %v954_v3, 0.0 }
 0x21f   : > { %v1058_v9 = vmax.f32 %v946_v6, 0.0  ;;  %v1088_v12 = vpack.c.bf16 %v1060_v7, %v1059_v10 }
 0x221   : > { %v1087_v11 = vpack.c.bf16 %v1058_v9, %v1057_v8 }
 0x223   : > { %2764 = vmatprep.mubr.bf16.mxu1 %v1087_v11 }
 0x224   : > { %2765 = vmatmul.mubr.bf16.gmra.mxu1 %v1088_v12 }
 0x226   : > { %v2722_v13 = vpop.f32.mrf.mxu1 }
 0x227   : > { %v967_v18 = vadd.f32 %v2722_v13, %v3356_v50 }
 0x228   : > { %v958_v14 = vpop.f32.mrf.mxu1 }
 0x229   : > { %v959_v16 = vadd.f32 %v3356_v50, %v958_v14  ;;  %v1063_v24 = vmax.f32 %v967_v18, 0.0 }
 0x22a   : > { %v2723_v15 = vpop.f32.mrf.mxu1 }
 0x22b   : > { %v970_v17 = vadd.f32 %v2723_v15, %v3356_v50  ;;  %v1061_v22 = vmax.f32 %v959_v16, 0.0 }
 0x22c   : > { %v961_v19 = vpop.f32.mrf.mxu1 }
 0x22d   : > { %v962_v20 = vadd.f32 %v3356_v50, %v961_v19  ;;  %v1064_v21 = vmax.f32 %v970_v17, 0.0 }
 0x22f   : > { %v1062_v23 = vmax.f32 %v962_v20, 0.0  ;;  %v1090_v26 = vpack.c.bf16 %v1064_v21, %v1063_v24 }
 0x231   : > { %v1089_v25 = vpack.c.bf16 %v1062_v23, %v1061_v22 }
 0x233   : > { %2768 = vmatprep.mubr.bf16.mxu1 %v1089_v25 }
 0x234   : > { %2769 = vmatmul.mubr.bf16.gmra.mxu1 %v1090_v26 }
 0x236   : > { %v2726_v27 = vpop.f32.mrf.mxu1 }
 0x237   : > { %v983_v32 = vadd.f32 %v2726_v27, %v3356_v50 }
 0x238   : > { %v974_v28 = vpop.f32.mrf.mxu1 }
 0x239   : > { %v975_v30 = vadd.f32 %v3356_v50, %v974_v28  ;;  %v1067_v38 = vmax.f32 %v983_v32, 0.0 }
 0x23a   : > { %v2727_v29 = vpop.f32.mrf.mxu1 }
 0x23b   : > { %v986_v31 = vadd.f32 %v2727_v29, %v3356_v50  ;;  %v1065_v36 = vmax.f32 %v975_v30, 0.0 }
 0x23c   : > { %v977_v33 = vpop.f32.mrf.mxu1 }
 0x23d   : > { %v978_v34 = vadd.f32 %v3356_v50, %v977_v33  ;;  %v1068_v35 = vmax.f32 %v986_v31, 0.0 }
 0x23f   : > { %v1066_v37 = vmax.f32 %v978_v34, 0.0  ;;  %v1092_v40 = vpack.c.bf16 %v1068_v35, %v1067_v38 }
 0x241   : > { %v1091_v39 = vpack.c.bf16 %v1066_v37, %v1065_v36 }
 0x243   : > { %2772 = vmatprep.mubr.bf16.mxu1 %v1091_v39 }
 0x244   : > { %2773 = vmatmul.mubr.bf16.gmra.mxu1 %v1092_v40 }
 0x246   : > { %v2730_v41 = vpop.f32.mrf.mxu1 }
 0x247   : > { %v999_v46 = vadd.f32 %v2730_v41, %v3356_v50 }
 0x248   : > { %v990_v42 = vpop.f32.mrf.mxu1 }
 0x249   : > { %v991_v44 = vadd.f32 %v3356_v50, %v990_v42  ;;  %v1071_v53 = vmax.f32 %v999_v46, 0.0 }
 0x24a   : > { %v2731_v43 = vpop.f32.mrf.mxu1 }
 0x24b   : > { %v1002_v45 = vadd.f32 %v2731_v43, %v3356_v50  ;;  %v1069_v51 = vmax.f32 %v991_v44, 0.0 }
 0x24c   : > { %v993_v47 = vpop.f32.mrf.mxu1 }
 0x24d   : > { %v994_v48 = vadd.f32 %v3356_v50, %v993_v47  ;;  %v1072_v49 = vmax.f32 %v1002_v45, 0.0 }
 0x24f   : > { %v1070_v52 = vmax.f32 %v994_v48, 0.0  ;;  %v1094_v55 = vpack.c.bf16 %v1072_v49, %v1071_v53 }
 0x251   : > { %v1093_v54 = vpack.c.bf16 %v1070_v52, %v1069_v51 }
 0x253   : > { %2776 = vmatprep.mubr.bf16.mxu1 %v1093_v54 }
 0x254   : > { %2777 = vmatmul.mubr.bf16.gmra.mxu1 %v1094_v55 }
 0x256   : > { %v2734_v56 = vpop.f32.mrf.mxu1 }
 0x257   : > { %v1015_v61 = vadd.f32 %v2734_v56, %v3356_v50 }
 0x258   : > { %v1006_v57 = vpop.f32.mrf.mxu1 }
 0x259   : > { %v1007_v59 = vadd.f32 %v3356_v50, %v1006_v57  ;;  %v1075_v3 = vmax.f32 %v1015_v61, 0.0 }
 0x25a   : > { %v2735_v58 = vpop.f32.mrf.mxu1 }
 0x25b   : > { %v1018_v60 = vadd.f32 %v2735_v58, %v3356_v50  ;;  %v1073_v1 = vmax.f32 %v1007_v59, 0.0 }
 0x25c   : > { %v1009_v62 = vpop.f32.mrf.mxu1 }
 0x25d   : > { %v1010_v63 = vadd.f32 %v3356_v50, %v1009_v62  ;;  %v1076_v0 = vmax.f32 %v1018_v60, 0.0 }
 0x25f   : > { %v1074_v2 = vmax.f32 %v1010_v63, 0.0  ;;  %v1096_v5 = vpack.c.bf16 %v1076_v0, %v1075_v3 }
 0x261   : > { %v1095_v4 = vpack.c.bf16 %v1074_v2, %v1073_v1 }
 0x263   : > { %2780 = vmatprep.mubr.bf16.mxu1 %v1095_v4 }
 0x264   : > { %2781 = vmatmul.mubr.bf16.gmra.mxu1 %v1096_v5 }
 0x266   : > { %v2738_v6 = vpop.f32.mrf.mxu1 }
 0x267   : > { %v1031_v11 = vadd.f32 %v2738_v6, %v3356_v50 }
 0x268   : > { %v1022_v7 = vpop.f32.mrf.mxu1 }
 0x269   : > { %v1023_v9 = vadd.f32 %v3356_v50, %v1022_v7  ;;  %v1079_v17 = vmax.f32 %v1031_v11, 0.0 }
 0x26a   : > { %v2739_v8 = vpop.f32.mrf.mxu1 }
 0x26b   : > { %v1034_v10 = vadd.f32 %v2739_v8, %v3356_v50  ;;  %v1077_v15 = vmax.f32 %v1023_v9, 0.0 }
 0x26c   : > { %v1025_v12 = vpop.f32.mrf.mxu1 }
 0x26d   : > { %v1026_v13 = vadd.f32 %v3356_v50, %v1025_v12  ;;  %v1080_v14 = vmax.f32 %v1034_v10, 0.0 }
 0x26f   : > { %v1078_v16 = vmax.f32 %v1026_v13, 0.0  ;;  %v1098_v19 = vpack.c.bf16 %v1080_v14, %v1079_v17 }
 0x271   : > { %v1097_v18 = vpack.c.bf16 %v1078_v16, %v1077_v15 }
 0x273   : > { %2784 = vmatprep.mubr.bf16.mxu1 %v1097_v18 }
 0x274   : > { %2785 = vmatmul.mubr.bf16.gmra.mxu1 %v1098_v19 }
 0x276   : > { %v2742_v20 = vpop.f32.mrf.mxu1 }
 0x277   : > { %v1047_v25 = vadd.f32 %v2742_v20, %v3356_v50 }
 0x278   : > { %v1038_v21 = vpop.f32.mrf.mxu1 }
 0x279   : > { %v1039_v23 = vadd.f32 %v3356_v50, %v1038_v21  ;;  %v1083_v31 = vmax.f32 %v1047_v25, 0.0 }
 0x27a   : > { %v2743_v22 = vpop.f32.mrf.mxu1 }
 0x27b   : > { %v1050_v24 = vadd.f32 %v2743_v22, %v3356_v50  ;;  %v1081_v29 = vmax.f32 %v1039_v23, 0.0 }
 0x27c   : > { %v1041_v26 = vpop.f32.mrf.mxu1 }
 0x27d   : > { %v1042_v27 = vadd.f32 %v3356_v50, %v1041_v26  ;;  %v1084_v28 = vmax.f32 %v1050_v24, 0.0 }
 0x27f   : > { %v1082_v30 = vmax.f32 %v1042_v27, 0.0  ;;  %v1100_v33 = vpack.c.bf16 %v1084_v28, %v1083_v31 }
 0x281   : > { %v1099_v32 = vpack.c.bf16 %v1082_v30, %v1081_v29 }
 0x283   : > { %2788 = vmatprep.mubr.bf16.mxu1 %v1099_v32 }
 0x284   : > { %2789 = vmatmul.mubr.bf16.gmra.mxu1 %v1100_v33 }
 0x2d4   : > { %v2762_v34 = vpop.f32.mrf.mxu1 }
 0x2d6   : > { %v1199_v35 = vpop.f32.mrf.mxu1 }
 0x2d8   : > { %v2763_v36 = vpop.f32.mrf.mxu1 }
 0x2d9   : > { %v2337_v37 = vpack.c.bf16 %v2763_v36, %v2762_v34 }
 0x2da   : > { %v1202_v38 = vpop.f32.mrf.mxu1 }
 0x2db   : > { %2409 = vst [vmem:[#allocation2 + $0x8] sm:$0xff] %v2337_v37   ;;  %v2332_v39 = vpack.c.bf16 %v1202_v38, %v1199_v35 }
 0x2dd   : > { %2333 = vst [vmem:[#allocation2] sm:$0xff] %v2332_v39  }
 0x2e4   : > { %v2766_v40 = vpop.f32.mrf.mxu1 }
 0x2e6   : > { %v1215_v41 = vpop.f32.mrf.mxu1 }
 0x2e8   : > { %v2767_v42 = vpop.f32.mrf.mxu1 }
 0x2e9   : > { %v2347_v50 = vpack.c.bf16 %v2767_v42, %v2766_v40 }
 0x2ea   : > { %v1218_v43 = vpop.f32.mrf.mxu1 }
 0x2eb   : > { %2411 = vst [vmem:[#allocation2 + $0x18] sm:$0xff] %v2347_v50   ;;  %v2342_v44 = vpack.c.bf16 %v1218_v43, %v1215_v41 }
 0x2ed   : > { %2410 = vst [vmem:[#allocation2 + $0x10] sm:$0xff] %v2342_v44  }
 0x2f4   : > { %v2770_v45 = vpop.f32.mrf.mxu1 }
 0x2f6   : > { %v1231_v46 = vpop.f32.mrf.mxu1 }
 0x2f8   : > { %v2771_v47 = vpop.f32.mrf.mxu1 }
 0x2f9   : > { %v2357_v48 = vpack.c.bf16 %v2771_v47, %v2770_v45 }
 0x2fa   : > { %v1234_v49 = vpop.f32.mrf.mxu1 }
 0x2fb   : > { %2413 = vst [vmem:[#allocation2 + $0x28] sm:$0xff] %v2357_v48   ;;  %v2352_v51 = vpack.c.bf16 %v1234_v49, %v1231_v46 }
 0x2fd   : > { %2412 = vst [vmem:[#allocation2 + $0x20] sm:$0xff] %v2352_v51  }
 0x304   : > { %v2774_v52 = vpop.f32.mrf.mxu1 }
 0x306   : > { %v1247_v53 = vpop.f32.mrf.mxu1 }
 0x308   : > { %v2775_v54 = vpop.f32.mrf.mxu1 }
 0x309   : > { %v2367_v55 = vpack.c.bf16 %v2775_v54, %v2774_v52 }
 0x30a   : > { %v1250_v56 = vpop.f32.mrf.mxu1 }
 0x30b   : > { %2415 = vst [vmem:[#allocation2 + $0x38] sm:$0xff] %v2367_v55   ;;  %v2362_v57 = vpack.c.bf16 %v1250_v56, %v1247_v53 }
 0x30d   : > { %2414 = vst [vmem:[#allocation2 + $0x30] sm:$0xff] %v2362_v57  }
 0x314   : > { %v2778_v58 = vpop.f32.mrf.mxu1 }
 0x316   : > { %v1263_v59 = vpop.f32.mrf.mxu1 }
 0x318   : > { %v2779_v60 = vpop.f32.mrf.mxu1 }
 0x319   : > { %v2377_v61 = vpack.c.bf16 %v2779_v60, %v2778_v58 }
 0x31a   : > { %v1266_v62 = vpop.f32.mrf.mxu1 }
 0x31b   : > { %2417 = vst [vmem:[#allocation2 + $0x48] sm:$0xff] %v2377_v61   ;;  %v2372_v63 = vpack.c.bf16 %v1266_v62, %v1263_v59 }
 0x31d   : > { %2416 = vst [vmem:[#allocation2 + $0x40] sm:$0xff] %v2372_v63  }
 0x324   : > { %v2782_v0 = vpop.f32.mrf.mxu1 }
 0x326   : > { %v1279_v1 = vpop.f32.mrf.mxu1 }
 0x328   : > { %v2783_v2 = vpop.f32.mrf.mxu1 }
 0x329   : > { %v2387_v3 = vpack.c.bf16 %v2783_v2, %v2782_v0 }
 0x32a   : > { %v1282_v4 = vpop.f32.mrf.mxu1 }
 0x32b   : > { %2419 = vst [vmem:[#allocation2 + $0x58] sm:$0xff] %v2387_v3   ;;  %v2382_v5 = vpack.c.bf16 %v1282_v4, %v1279_v1 }
 0x32d   : > { %2418 = vst [vmem:[#allocation2 + $0x50] sm:$0xff] %v2382_v5  }
 0x334   : > { %v2786_v6 = vpop.f32.mrf.mxu1 }
 0x336   : > { %v1295_v7 = vpop.f32.mrf.mxu1 }
 0x338   : > { %v2787_v8 = vpop.f32.mrf.mxu1 }
 0x339   : > { %v2397_v9 = vpack.c.bf16 %v2787_v8, %v2786_v6 }
 0x33a   : > { %v1298_v10 = vpop.f32.mrf.mxu1 }
 0x33b   : > { %2421 = vst [vmem:[#allocation2 + $0x68] sm:$0xff] %v2397_v9   ;;  %v2392_v11 = vpack.c.bf16 %v1298_v10, %v1295_v7 }
 0x33d   : > { %2420 = vst [vmem:[#allocation2 + $0x60] sm:$0xff] %v2392_v11  }
 0x344   : > { %v2790_v12 = vpop.f32.mrf.mxu1 }
 0x346   : > { %v1311_v13 = vpop.f32.mrf.mxu1 }
 0x348   : > { %v2791_v14 = vpop.f32.mrf.mxu1 }
 0x349   : > { %v2407_v15 = vpack.c.bf16 %v2791_v14, %v2790_v12 }
 0x34a   : > { %v1314_v16 = vpop.f32.mrf.mxu1 }
 0x34b   : > { %2423 = vst [vmem:[#allocation2 + $0x78] sm:$0xff] %v2407_v15   ;;  %v2402_v17 = vpack.c.bf16 %v1314_v16, %v1311_v13 }
 0x34d   : > { %2422 = vst [vmem:[#allocation2 + $0x70] sm:$0xff] %v2402_v17  }
 0x34e PF: > { %p2243_p2 = scmp.ne.s32.totalorder %s3193_s21, 1 }
 0x350   : > { %1493 = sbr.rel (%p2243_p2) target bundleno = 1146 (0x47a), region = 68 }
 0x355   : > { %v2971_v18 = vld [vmem:[#allocation2 + $0x78] sm:$0xff]   ;;  %v2973_v20 = vld [vmem:[#allocation2 + $0x70] sm:$0xff]   ;;  %v2975_v22 = vld [vmem:[#allocation2 + $0x68] sm:$0xff]  }
 0x356   : > { %v2972_v19 = vld [vmem:[#allocation2 + $0x38] sm:$0xff]   ;;  %2584 = vmatprep.subr.bf16.mxu0 %v2971_v18  ;;  %2792 = vmatprep.subr.bf16.mxu1 %v2971_v18  ;;  %v2974_v21 = vld [vmem:[#allocation2 + $0x30] sm:$0xff]   ;;  %v2976_v23 = vld [vmem:[#allocation2 + $0x28] sm:$0xff]  }
 0x357   : > { %2585 = vmatpush3.bf16.msra.mxu0 %v2972_v19  ;;  %2800 = vmatpush3.bf16.msra.mxu1 %v2972_v19  ;;  %v2977_v24 = vld [vmem:[#allocation2 + $0x60] sm:$0xff]   ;;  %v2979_v26 = vld [vmem:[#allocation2 + $0x58] sm:$0xff]   ;;  %v2981_v28 = vld [vmem:[#allocation2 + $0x50] sm:$0xff]  }
 0x358   : > { %2586 = vmatprep.subr.bf16.mxu0 %v2973_v20  ;;  %2793 = vmatprep.subr.bf16.mxu1 %v2973_v20  ;;  %v2978_v25 = vld [vmem:[#allocation2 + $0x20] sm:$0xff]   ;;  %v2980_v27 = vld [vmem:[#allocation2 + $0x18] sm:$0xff]   ;;  %v2982_v31 = vld [vmem:[#allocation2 + $0x10] sm:$0xff]  }
 0x359   : > { %v2989_v29 = vld [vmem:[#allocation6 + $0x4] ss:$8 sps:$4 sm:$0xff]   ;;  %v2987_v36 = vld [vmem:[#allocation6] ss:$8 sps:$4 sm:$0xff]   ;;  %v2993_v38 = vld [vmem:[#allocation6 + $0x14] ss:$8 sps:$4 sm:$0xff]  }
 0x35a   : > { %v2992_v30 = vld [vmem:[#allocation6 + $0x84] ss:$8 sps:$4 sm:$0xff]   ;;  %1853 = vmatprep.mubr.bf16.mxu0 %v2989_v29  ;;  %v2990_v37 = vld [vmem:[#allocation6 + $0x80] ss:$8 sps:$4 sm:$0xff]   ;;  %v2995_v39 = vld [vmem:[#allocation6 + $0x94] ss:$8 sps:$4 sm:$0xff]  }
 0x35b   : > { %2587 = vmatpush3.bf16.msra.mxu0 %v2974_v21  ;;  %2801 = vmatpush3.bf16.msra.mxu1 %v2974_v21  ;;  %v2983_v32 = vld [vmem:[#allocation2 + $0x48] sm:$0xff]   ;;  %v2985_v34 = vld [vmem:[#allocation2 + $0x40] sm:$0xff]   ;;  %v2997_v40 = vld [vmem:[#allocation6 + $0x10] ss:$8 sps:$4 sm:$0xff]  }
 0x35c   : > { %2588 = vmatprep.subr.bf16.mxu0 %v2975_v22  ;;  %2794 = vmatprep.subr.bf16.mxu1 %v2975_v22  ;;  %v2984_v33 = vld [vmem:[#allocation2 + $0x8] sm:$0xff]   ;;  %v2986_v35 = vld [vmem:[#allocation2] sm:$0xff]   ;;  %v2998_v41 = vld [vmem:[#allocation6 + $0x90] ss:$8 sps:$4 sm:$0xff]  }
 0x35d   : > { %1917 = vmatprep.mubr.bf16.mxu1 %v2992_v30  ;;  %v2999_v42 = vld [vmem:[#allocation6 + $0x24] ss:$8 sps:$4 sm:$0xff]   ;;  %v3003_v43 = vld [vmem:[#allocation6 + $0x20] ss:$8 sps:$4 sm:$0xff]   ;;  %v3005_v45 = vld [vmem:[#allocation6 + $0x34] ss:$8 sps:$4 sm:$0xff]  }
 0x35e   : > { %v3001_v50 = vld [vmem:[#allocation6 + $0xa4] ss:$8 sps:$4 sm:$0xff]   ;;  %v3004_v44 = vld [vmem:[#allocation6 + $0xa0] ss:$8 sps:$4 sm:$0xff]   ;;  %v3007_v46 = vld [vmem:[#allocation6 + $0xb4] ss:$8 sps:$4 sm:$0xff]  }
 0x35f   : > { %2589 = vmatpush3.bf16.msra.mxu0 %v2976_v23  ;;  %2802 = vmatpush3.bf16.msra.mxu1 %v2976_v23  ;;  %v3009_v47 = vld [vmem:[#allocation6 + $0x30] ss:$8 sps:$4 sm:$0xff]   ;;  %v3011_v49 = vld [vmem:[#allocation6 + $0x44] ss:$8 sps:$4 sm:$0xff]   ;;  %v3015_v52 = vld [vmem:[#allocation6 + $0x40] ss:$8 sps:$4 sm:$0xff]  }
 0x360   : > { %2590 = vmatprep.subr.bf16.mxu0 %v2977_v24  ;;  %2795 = vmatprep.subr.bf16.mxu1 %v2977_v24  ;;  %v3010_v48 = vld [vmem:[#allocation6 + $0xb0] ss:$8 sps:$4 sm:$0xff]   ;;  %v3013_v51 = vld [vmem:[#allocation6 + $0xc4] ss:$8 sps:$4 sm:$0xff]   ;;  %v3016_v53 = vld [vmem:[#allocation6 + $0xc0] ss:$8 sps:$4 sm:$0xff]  }
 0x361   : > { %v3017_v54 = vld [vmem:[#allocation6 + $0x54] ss:$8 sps:$4 sm:$0xff]   ;;  %v3021_v56 = vld [vmem:[#allocation6 + $0x50] ss:$8 sps:$4 sm:$0xff]   ;;  %v3023_v58 = vld [vmem:[#allocation6 + $0x64] ss:$8 sps:$4 sm:$0xff]  }
 0x362   : > { %v3019_v55 = vld [vmem:[#allocation6 + $0xd4] ss:$8 sps:$4 sm:$0xff]   ;;  %v3022_v57 = vld [vmem:[#allocation6 + $0xd0] ss:$8 sps:$4 sm:$0xff]   ;;  %v3025_v59 = vld [vmem:[#allocation6 + $0xe4] ss:$8 sps:$4 sm:$0xff]  }
 0x363   : > { %2591 = vmatpush3.bf16.msra.mxu0 %v2978_v25  ;;  %2803 = vmatpush3.bf16.msra.mxu1 %v2978_v25  ;;  %v3027_v60 = vld [vmem:[#allocation6 + $0x60] ss:$8 sps:$4 sm:$0xff]   ;;  %v3029_v62 = vld [vmem:[#allocation6 + $0x74] ss:$8 sps:$4 sm:$0xff]   ;;  %v3033_v0 = vld [vmem:[#allocation6 + $0x70] ss:$8 sps:$4 sm:$0xff]  }
 0x364   : > { %2592 = vmatprep.subr.bf16.mxu0 %v2979_v26  ;;  %2796 = vmatprep.subr.bf16.mxu1 %v2979_v26  ;;  %v3028_v61 = vld [vmem:[#allocation6 + $0xe0] ss:$8 sps:$4 sm:$0xff]   ;;  %v3031_v63 = vld [vmem:[#allocation6 + $0xf4] ss:$8 sps:$4 sm:$0xff]   ;;  %v3034_v1 = vld [vmem:[#allocation6 + $0xf0] ss:$8 sps:$4 sm:$0xff]  }
 0x365   : > { %v3394_v4 = vld [vmem:[%s3458_s5] ss:$0 sm:$0xff] }
 0x367   : > { %2593 = vmatpush3.bf16.msra.mxu0 %v2980_v27  ;;  %2804 = vmatpush3.bf16.msra.mxu1 %v2980_v27 }
 0x368   : > { %2594 = vmatprep.subr.bf16.mxu0 %v2981_v28  ;;  %2797 = vmatprep.subr.bf16.mxu1 %v2981_v28 }
 0x36b   : > { %2595 = vmatpush3.bf16.msra.mxu0 %v2982_v31  ;;  %2805 = vmatpush3.bf16.msra.mxu1 %v2982_v31 }
 0x36c   : > { %2596 = vmatprep.subr.bf16.mxu0 %v2983_v32  ;;  %2798 = vmatprep.subr.bf16.mxu1 %v2983_v32 }
 0x36f   : > { %2597 = vmatpush3.bf16.msra.mxu0 %v2984_v33  ;;  %2806 = vmatpush3.bf16.msra.mxu1 %v2984_v33 }
 0x370   : > { %2598 = vmatprep.subr.bf16.mxu0 %v2985_v34  ;;  %2799 = vmatprep.subr.bf16.mxu1 %v2985_v34 }
 0x373   : > { %2599 = vmatpush3.bf16.msra.mxu0 %v2986_v35  ;;  %2807 = vmatpush3.bf16.msra.mxu1 %v2986_v35 }
 0x376   : > { %1854 = vmatmul.mubr.bf16.vlgmr.msra.gmra.mxu0 %v2987_v36  ;;  %1918 = vmatmul.mubr.bf16.vlgmr.msra.gmra.mxu1 %v2990_v37 }
 0x377   : > { %1861 = vmatprep.mubr.bf16.mxu0 %v2993_v38  ;;  %1925 = vmatprep.mubr.bf16.mxu1 %v2995_v39 }
 0x37e   : > { %1862 = vmatmul.mubr.bf16.gmra.mxu0 %v2997_v40  ;;  %1926 = vmatmul.mubr.bf16.gmra.mxu1 %v2998_v41 }
 0x37f   : > { %1869 = vmatprep.mubr.bf16.mxu0 %v2999_v42  ;;  %1933 = vmatprep.mubr.bf16.mxu1 %v3001_v50 }
 0x386   : > { %1870 = vmatmul.mubr.bf16.gmra.mxu0 %v3003_v43  ;;  %1934 = vmatmul.mubr.bf16.gmra.mxu1 %v3004_v44 }
 0x387   : > { %1877 = vmatprep.mubr.bf16.mxu0 %v3005_v45  ;;  %1941 = vmatprep.mubr.bf16.mxu1 %v3007_v46 }
 0x38e   : > { %1878 = vmatmul.mubr.bf16.gmra.mxu0 %v3009_v47  ;;  %1942 = vmatmul.mubr.bf16.gmra.mxu1 %v3010_v48 }
 0x38f   : > { %1885 = vmatprep.mubr.bf16.mxu0 %v3011_v49  ;;  %1949 = vmatprep.mubr.bf16.mxu1 %v3013_v51 }
 0x396   : > { %1886 = vmatmul.mubr.bf16.gmra.mxu0 %v3015_v52  ;;  %1950 = vmatmul.mubr.bf16.gmra.mxu1 %v3016_v53 }
 0x397   : > { %1893 = vmatprep.mubr.bf16.mxu0 %v3017_v54  ;;  %1957 = vmatprep.mubr.bf16.mxu1 %v3019_v55 }
 0x39e   : > { %1894 = vmatmul.mubr.bf16.gmra.mxu0 %v3021_v56  ;;  %1958 = vmatmul.mubr.bf16.gmra.mxu1 %v3022_v57 }
 0x39f   : > { %1901 = vmatprep.mubr.bf16.mxu0 %v3023_v58  ;;  %1965 = vmatprep.mubr.bf16.mxu1 %v3025_v59 }
 0x3a6   : > { %1902 = vmatmul.mubr.bf16.gmra.mxu0 %v3027_v60  ;;  %1966 = vmatmul.mubr.bf16.gmra.mxu1 %v3028_v61 }
 0x3a7   : > { %1909 = vmatprep.mubr.bf16.mxu0 %v3029_v62  ;;  %1973 = vmatprep.mubr.bf16.mxu1 %v3031_v63 }
 0x3ae   : > { %1910 = vmatmul.mubr.bf16.gmra.mxu0 %v3033_v0  ;;  %1974 = vmatmul.mubr.bf16.gmra.mxu1 %v3034_v1 }
 0x436   : > { %v2600_v2 = vpop.f32.mrf.mxu0  ;;  %v2648_v3 = vpop.f32.mrf.mxu1 }
 0x438   : > { %v2601_v5 = vpop.f32.mrf.mxu0  ;;  %v2649_v6 = vpop.f32.mrf.mxu1 }
 0x439   : > { %v2602_v7 = vadd.f32 %v2601_v5, %v2600_v2  ;;  %v2650_v8 = vadd.f32 %v2649_v6, %v2648_v3 }
 0x43a   : > { %v2603_v9 = vpop.f32.mrf.mxu0  ;;  %v2651_v10 = vpop.f32.mrf.mxu1 }
 0x43b   : > { %v1856_v11 = vadd.f32 %v2602_v7, %v3394_v4  ;;  %v1920_v12 = vadd.f32 %v2650_v8, %v3394_v4 }
 0x43c   : > { %v2604_v13 = vpop.f32.mrf.mxu0  ;;  %v2652_v14 = vpop.f32.mrf.mxu1 }
 0x43d   : > { %1982 = vst [vmem:[#allocation11] sm:$0xff] %v1856_v11  ;;  %1998 = vst [vmem:[#allocation11 + $0x80] sm:$0xff] %v1920_v12  ;;  %v2605_v15 = vadd.f32 %v2604_v13, %v2603_v9  ;;  %v2653_v16 = vadd.f32 %v2652_v14, %v2651_v10 }
 0x43e   : > { %v2606_v17 = vpop.f32.mrf.mxu0  ;;  %v2654_v18 = vpop.f32.mrf.mxu1 }
 0x43f   : > { %v1859_v19 = vadd.f32 %v2605_v15, %v3394_v4  ;;  %v1923_v20 = vadd.f32 %v2653_v16, %v3394_v4 }
 0x440   : > { %v2607_v21 = vpop.f32.mrf.mxu0  ;;  %v2655_v22 = vpop.f32.mrf.mxu1 }
 0x441   : > { %1983 = vst [vmem:[#allocation11 + $0x8] sm:$0xff] %v1859_v19  ;;  %1999 = vst [vmem:[#allocation11 + $0x88] sm:$0xff] %v1923_v20  ;;  %v2608_v23 = vadd.f32 %v2607_v21, %v2606_v17  ;;  %v2656_v24 = vadd.f32 %v2655_v22, %v2654_v18 }
 0x442   : > { %v2609_v25 = vpop.f32.mrf.mxu0  ;;  %v2657_v26 = vpop.f32.mrf.mxu1 }
 0x443   : > { %v1864_v27 = vadd.f32 %v2608_v23, %v3394_v4  ;;  %v1928_v28 = vadd.f32 %v2656_v24, %v3394_v4 }
 0x444   : > { %v2610_v29 = vpop.f32.mrf.mxu0  ;;  %v2658_v30 = vpop.f32.mrf.mxu1 }
 0x445   : > { %1984 = vst [vmem:[#allocation11 + $0x10] sm:$0xff] %v1864_v27  ;;  %2000 = vst [vmem:[#allocation11 + $0x90] sm:$0xff] %v1928_v28  ;;  %v2611_v31 = vadd.f32 %v2610_v29, %v2609_v25  ;;  %v2659_v32 = vadd.f32 %v2658_v30, %v2657_v26 }
 0x446   : > { %v2612_v33 = vpop.f32.mrf.mxu0  ;;  %v2660_v34 = vpop.f32.mrf.mxu1 }
 0x447   : > { %v1867_v35 = vadd.f32 %v2611_v31, %v3394_v4  ;;  %v1931_v36 = vadd.f32 %v2659_v32, %v3394_v4 }
 0x448   : > { %v2613_v37 = vpop.f32.mrf.mxu0  ;;  %v2661_v38 = vpop.f32.mrf.mxu1 }
 0x449   : > { %1985 = vst [vmem:[#allocation11 + $0x18] sm:$0xff] %v1867_v35  ;;  %2001 = vst [vmem:[#allocation11 + $0x98] sm:$0xff] %v1931_v36  ;;  %v2614_v39 = vadd.f32 %v2613_v37, %v2612_v33  ;;  %v2662_v40 = vadd.f32 %v2661_v38, %v2660_v34 }
 0x44a   : > { %v2615_v41 = vpop.f32.mrf.mxu0  ;;  %v2663_v42 = vpop.f32.mrf.mxu1 }
 0x44b   : > { %v1872_v50 = vadd.f32 %v2614_v39, %v3394_v4  ;;  %v1936_v43 = vadd.f32 %v2662_v40, %v3394_v4 }
 0x44c   : > { %v2616_v44 = vpop.f32.mrf.mxu0  ;;  %v2664_v45 = vpop.f32.mrf.mxu1 }
 0x44d   : > { %1986 = vst [vmem:[#allocation11 + $0x20] sm:$0xff] %v1872_v50  ;;  %2002 = vst [vmem:[#allocation11 + $0xa0] sm:$0xff] %v1936_v43  ;;  %v2617_v46 = vadd.f32 %v2616_v44, %v2615_v41  ;;  %v2665_v47 = vadd.f32 %v2664_v45, %v2663_v42 }
 0x44e   : > { %v2618_v48 = vpop.f32.mrf.mxu0  ;;  %v2666_v49 = vpop.f32.mrf.mxu1 }
 0x44f   : > { %v1875_v51 = vadd.f32 %v2617_v46, %v3394_v4  ;;  %v1939_v52 = vadd.f32 %v2665_v47, %v3394_v4 }
 0x450   : > { %v2619_v53 = vpop.f32.mrf.mxu0  ;;  %v2667_v54 = vpop.f32.mrf.mxu1 }
 0x451   : > { %1987 = vst [vmem:[#allocation11 + $0x28] sm:$0xff] %v1875_v51  ;;  %2003 = vst [vmem:[#allocation11 + $0xa8] sm:$0xff] %v1939_v52  ;;  %v2620_v55 = vadd.f32 %v2619_v53, %v2618_v48  ;;  %v2668_v56 = vadd.f32 %v2667_v54, %v2666_v49 }
 0x452   : > { %v2621_v57 = vpop.f32.mrf.mxu0  ;;  %v2669_v58 = vpop.f32.mrf.mxu1 }
 0x453   : > { %v1880_v59 = vadd.f32 %v2620_v55, %v3394_v4  ;;  %v1944_v60 = vadd.f32 %v2668_v56, %v3394_v4 }
 0x454   : > { %v2622_v61 = vpop.f32.mrf.mxu0  ;;  %v2670_v62 = vpop.f32.mrf.mxu1 }
 0x455   : > { %1988 = vst [vmem:[#allocation11 + $0x30] sm:$0xff] %v1880_v59  ;;  %2004 = vst [vmem:[#allocation11 + $0xb0] sm:$0xff] %v1944_v60  ;;  %v2623_v63 = vadd.f32 %v2622_v61, %v2621_v57  ;;  %v2671_v0 = vadd.f32 %v2670_v62, %v2669_v58 }
 0x456   : > { %v2624_v1 = vpop.f32.mrf.mxu0  ;;  %v2672_v2 = vpop.f32.mrf.mxu1 }
 0x457   : > { %v1883_v3 = vadd.f32 %v2623_v63, %v3394_v4  ;;  %v1947_v5 = vadd.f32 %v2671_v0, %v3394_v4 }
 0x458   : > { %v2625_v6 = vpop.f32.mrf.mxu0  ;;  %v2673_v7 = vpop.f32.mrf.mxu1 }
 0x459   : > { %1989 = vst [vmem:[#allocation11 + $0x38] sm:$0xff] %v1883_v3  ;;  %2005 = vst [vmem:[#allocation11 + $0xb8] sm:$0xff] %v1947_v5  ;;  %v2626_v8 = vadd.f32 %v2625_v6, %v2624_v1  ;;  %v2674_v9 = vadd.f32 %v2673_v7, %v2672_v2 }
 0x45a   : > { %v2627_v10 = vpop.f32.mrf.mxu0  ;;  %v2675_v11 = vpop.f32.mrf.mxu1 }
 0x45b   : > { %v1888_v12 = vadd.f32 %v2626_v8, %v3394_v4  ;;  %v1952_v13 = vadd.f32 %v2674_v9, %v3394_v4 }
 0x45c   : > { %v2628_v14 = vpop.f32.mrf.mxu0  ;;  %v2676_v15 = vpop.f32.mrf.mxu1 }
 0x45d   : > { %1990 = vst [vmem:[#allocation11 + $0x40] sm:$0xff] %v1888_v12  ;;  %2006 = vst [vmem:[#allocation11 + $0xc0] sm:$0xff] %v1952_v13  ;;  %v2629_v16 = vadd.f32 %v2628_v14, %v2627_v10  ;;  %v2677_v17 = vadd.f32 %v2676_v15, %v2675_v11 }
 0x45e   : > { %v2630_v18 = vpop.f32.mrf.mxu0  ;;  %v2678_v19 = vpop.f32.mrf.mxu1 }
 0x45f   : > { %v1891_v20 = vadd.f32 %v2629_v16, %v3394_v4  ;;  %v1955_v21 = vadd.f32 %v2677_v17, %v3394_v4 }
 0x460   : > { %v2631_v22 = vpop.f32.mrf.mxu0  ;;  %v2679_v23 = vpop.f32.mrf.mxu1 }
 0x461   : > { %1991 = vst [vmem:[#allocation11 + $0x48] sm:$0xff] %v1891_v20  ;;  %2007 = vst [vmem:[#allocation11 + $0xc8] sm:$0xff] %v1955_v21  ;;  %v2632_v24 = vadd.f32 %v2631_v22, %v2630_v18  ;;  %v2680_v25 = vadd.f32 %v2679_v23, %v2678_v19 }
 0x462   : > { %v2633_v26 = vpop.f32.mrf.mxu0  ;;  %v2681_v27 = vpop.f32.mrf.mxu1 }
 0x463   : > { %v1896_v28 = vadd.f32 %v2632_v24, %v3394_v4  ;;  %v1960_v29 = vadd.f32 %v2680_v25, %v3394_v4 }
 0x464   : > { %v2634_v30 = vpop.f32.mrf.mxu0  ;;  %v2682_v31 = vpop.f32.mrf.mxu1 }
 0x465   : > { %1992 = vst [vmem:[#allocation11 + $0x50] sm:$0xff] %v1896_v28  ;;  %2008 = vst [vmem:[#allocation11 + $0xd0] sm:$0xff] %v1960_v29  ;;  %v2635_v32 = vadd.f32 %v2634_v30, %v2633_v26  ;;  %v2683_v33 = vadd.f32 %v2682_v31, %v2681_v27 }
 0x466   : > { %v2636_v34 = vpop.f32.mrf.mxu0  ;;  %v2684_v35 = vpop.f32.mrf.mxu1 }
 0x467   : > { %v1899_v36 = vadd.f32 %v2635_v32, %v3394_v4  ;;  %v1963_v37 = vadd.f32 %v2683_v33, %v3394_v4 }
 0x468   : > { %v2637_v38 = vpop.f32.mrf.mxu0  ;;  %v2685_v39 = vpop.f32.mrf.mxu1 }
 0x469   : > { %1993 = vst [vmem:[#allocation11 + $0x58] sm:$0xff] %v1899_v36  ;;  %2009 = vst [vmem:[#allocation11 + $0xd8] sm:$0xff] %v1963_v37  ;;  %v2638_v40 = vadd.f32 %v2637_v38, %v2636_v34  ;;  %v2686_v41 = vadd.f32 %v2685_v39, %v2684_v35 }
 0x46a   : > { %v2639_v42 = vpop.f32.mrf.mxu0  ;;  %v2687_v50 = vpop.f32.mrf.mxu1 }
 0x46b   : > { %v1904_v43 = vadd.f32 %v2638_v40, %v3394_v4  ;;  %v1968_v44 = vadd.f32 %v2686_v41, %v3394_v4 }
 0x46c   : > { %v2640_v45 = vpop.f32.mrf.mxu0  ;;  %v2688_v46 = vpop.f32.mrf.mxu1 }
 0x46d   : > { %1994 = vst [vmem:[#allocation11 + $0x60] sm:$0xff] %v1904_v43  ;;  %2010 = vst [vmem:[#allocation11 + $0xe0] sm:$0xff] %v1968_v44  ;;  %v2641_v47 = vadd.f32 %v2640_v45, %v2639_v42  ;;  %v2689_v48 = vadd.f32 %v2688_v46, %v2687_v50 }
 0x46e   : > { %v2642_v49 = vpop.f32.mrf.mxu0  ;;  %v2690_v51 = vpop.f32.mrf.mxu1 }
 0x46f   : > { %v1907_v52 = vadd.f32 %v2641_v47, %v3394_v4  ;;  %v1971_v53 = vadd.f32 %v2689_v48, %v3394_v4 }
 0x470   : > { %v2643_v54 = vpop.f32.mrf.mxu0  ;;  %v2691_v55 = vpop.f32.mrf.mxu1 }
 0x471   : > { %1995 = vst [vmem:[#allocation11 + $0x68] sm:$0xff] %v1907_v52  ;;  %2011 = vst [vmem:[#allocation11 + $0xe8] sm:$0xff] %v1971_v53  ;;  %v2644_v56 = vadd.f32 %v2643_v54, %v2642_v49  ;;  %v2692_v57 = vadd.f32 %v2691_v55, %v2690_v51 }
 0x472   : > { %v2645_v58 = vpop.f32.mrf.mxu0  ;;  %v2693_v59 = vpop.f32.mrf.mxu1 }
 0x473   : > { %v1912_v60 = vadd.f32 %v2644_v56, %v3394_v4  ;;  %v1976_v61 = vadd.f32 %v2692_v57, %v3394_v4 }
 0x474   : > { %v2646_v62 = vpop.f32.mrf.mxu0  ;;  %v2694_v63 = vpop.f32.mrf.mxu1 }
 0x475   : > { %1996 = vst [vmem:[#allocation11 + $0x70] sm:$0xff] %v1912_v60  ;;  %2012 = vst [vmem:[#allocation11 + $0xf0] sm:$0xff] %v1976_v61  ;;  %v2647_v0 = vadd.f32 %v2646_v62, %v2645_v58  ;;  %v2695_v1 = vadd.f32 %v2694_v63, %v2693_v59 }
 0x477   : > { %v1915_v2 = vadd.f32 %v2647_v0, %v3394_v4  ;;  %v1979_v3 = vadd.f32 %v2695_v1, %v3394_v4 }
 0x479   : > { %1997 = vst [vmem:[#allocation11 + $0x78] sm:$0xff] %v1915_v2  ;;  %2013 = vst [vmem:[#allocation11 + $0xf8] sm:$0xff] %v1979_v3 }
 0x47a PF: > { %p3430_p5 = scmp.eq.s32.totalorder %s2133_s26, 1  ;;  %s3211_s17 = smov [#allocation11]  }
 0x47b   : > { %s2030_s18 = sshll.u32 %s3211_s17, 4  ;;  %s2031_s18 = int_to_ptr.vmem [resolvable:$true] %s2030_s18 }
 0x47c   : > { %s3139_s19 = scalar_lea.vmem %s2031_s18, 4096  ;;  %s3145_s20 = scalar_lea.vmem %s2031_s18, 8192 }
 0x47d   : > { %p3140_p7 = scmp.ne.s32.totalorder %s2031_s18, %s3139_s19  ;;  %p3146_p9 = scmp.lt.s32.totalorder %s2031_s18, %s2031_s18 }
 0x47e   : > { %p3147_p10 = scmp.lt.s32.totalorder %s3145_s20, %s3139_s19 }
 0x47f   : > { %p3141_p4 = pnand %p3140_p7, %p3430_p5 }
 0x480   : > { %p3148_p11 = por %p3147_p10, %p3146_p9 }
 0x481   : > { %p3142_p8 = pneg %p3141_p4 }
 0x483   : > { %p3149_p12 = pnand %p3148_p11, %p3142_p8 }
 0x485   : > { %3152 = shalt.err (!%p3149_p12)
}
 0x486   : > { %s3212_s24 = smov 128   ;;  %s3213_s26 = smov 8  }
 0x487   : > { %2825 = dma.vmem_to_hbm [thread:$0]  (%p3430_p5), %s2031_s18, 4096, %s3459_s6, [#allocation5], %s3212_s24, %s3212_s24, %s3213_s26  }
 0x488 PF: > { %p2854_p6 = scmp.ge.s32.totalorder %s3201_s23, 2  ;;  %p2855_p13 = scmp.eq.s32.totalorder %s2134_s27, 1 }
 0x48a   : > { %p2842_p0 = pnand %p2855_p13, %p2854_p6 }
 0x48c   : > { %p2843_p1 = pneg %p2842_p0 }
 0x48e   : > { %3188 = dma.done.wait (%p2843_p1), [#allocation5], 4096  }
 0x48f   : > { %3190 = vsyncadd (%p2843_p1), [#allocation5], 4294963200  ;;  %s22_s23 = sadd.s32 1, %s3201_s23   ;;  %s3465_s21 = smov %s3197_s22 }
 0x490   : > { %p19_p3 = scmp.ge.s32.totalorder %s22_s23, 4   ;;  %s3466_s22 = smov %s3468_s7 }
 0x492   :  { %21 = sbr.rel (!%p19_p3) target bundleno = 6 (0x6), region = 103 }
 0x497   :  { %2051 = vsyncpa [#allocation4], 1 }
 0x498   :  { %2053 = vsyncpa [#allocation4 + $0x1], 1 }
 0x499   :  { %2054 = vsyncpa [#allocation7], 1 }
 0x49a   :  { %2055 = vsyncpa [#allocation10], 1 }
 0x49b   :  { %2056 = vsyncpa [#allocation5], 1 }
 0x49c   :  { %2058 = vsyncpa [#allocation5 + $0x1], 1 }

</bundles_post_ra>
